<compile_context>
chip_gen: v7x
topology: tpu7x:2x2x1
jax: 0.10.0
libtpu: 0.0.40
codegen_flags: <defaults>
</compile_context>

<pallas_src>
import jax
import jax.numpy as jnp
from jax.experimental import pallas as pl
from jax.experimental.pallas import tpu as pltpu

# --- hyperparameters (hp.*) -------------------------------------------------
DENSENET_NUM_FEATURES = 1024   # hp.DENSENET_NUM_FEATURES (DenseNet-121)
HASH_BITS = 64                 # hp.HASH_BITS
PROJ_DIM = 128                 # hp.PROJ_DIM
MARGIN = 0.5                   # hp.MARGIN (LeakyReLU negative_slope)

HASH_PAD = 128                 # lane-dense padded hash width (>= HASH_BITS)
MAX_TB = 1024                  # max batch-tile rows (bf16 x-tile = 2 MiB)


def _ceil_div(a, b):
    return -(-a // b)


def _round_up(a, m):
    return _ceil_div(a, m) * m


def _leaky_relu(x, slope):
    return jnp.where(x > 0, x, slope * x)


def cbir_kernel(x_ref, w1_ref, b1_ref, w2_ref, b2_ref, w3_ref, b3_ref,
                wp1_ref, wp2_ref, hash_ref, z_ref):
    """Whole CBIR MLP head: lin1->lrelu->lin2->lrelu->lin3 -> sigmoid,
    plus projector: lin (no bias) -> relu -> lin (no bias).

    Matmul operands are bf16 (f32 MXU accumulation); VPU/EUP math stays in f32
    for v5e compatibility.  w3/b3 are zero-padded to HASH_PAD output columns
    and the projector weights are zero-padded to full 128x128 tiles, so the
    padded lanes are exactly 0 everywhere and do not affect z.
    """
    x = x_ref[...]                       # already bf16 (cast done in wrapper)

    # lin1 + LeakyReLU(MARGIN)
    h = jnp.dot(x, w1_ref[...], preferred_element_type=jnp.float32) + b1_ref[...]
    h = _leaky_relu(h, MARGIN)

    # lin2 + LeakyReLU(MARGIN)
    h = jnp.dot(h.astype(jnp.bfloat16), w2_ref[...],
                preferred_element_type=jnp.float32) + b2_ref[...]
    h = _leaky_relu(h, MARGIN)

    # lin3 (pre-sigmoid hash logits), lane-dense padded to HASH_PAD columns
    logits = jnp.dot(h.astype(jnp.bfloat16), w3_ref[...],
                     preferred_element_type=jnp.float32) + b3_ref[...]

    # sigmoid(output) -> first return value (unmasked 128-lane store)
    hash_ref[...] = jax.nn.sigmoid(logits).astype(hash_ref.dtype)

    # projector on the *pre-sigmoid* output (matches PyTorch: z = projector(output)).
    p = jnp.dot(logits.astype(jnp.bfloat16), wp1_ref[...],
                preferred_element_type=jnp.float32)
    p = jnp.maximum(p, 0.0)
    z_ref[...] = jnp.dot(p.astype(jnp.bfloat16), wp2_ref[...],
                         preferred_element_type=jnp.float32).astype(z_ref.dtype)


def _choose_tb(batch):
    """Batch-tile rows: as big as possible (<= MAX_TB), multiple of 16 (bf16
    sublane packing), and an EVEN number of tiles whenever the batch needs more
    than one so v7x's two TensorCores stay balanced."""
    if batch <= 16:
        return 16
    n = max(2, pl.cdiv(batch, MAX_TB))
    if n % 2:
        n += 1                           # even tile count -> balanced megacore
    tb = _round_up(pl.cdiv(batch, n), 16)
    return max(16, min(MAX_TB, tb))


def prepare_params(params):
    """One-time parameter prep (do NOT call per forward): bf16 weight casts and
    zero lane-padding so the hot path launches nothing but the kernel."""
    w1, b1, w2, b2, w3, b3, wp1, wp2 = params
    pad_n = HASH_PAD - HASH_BITS
    w1b = w1.astype(jnp.bfloat16)
    w2b = w2.astype(jnp.bfloat16)
    # lin3 padded to 128 output lanes -> padded logit lanes are exactly 0.
    w3b = jnp.pad(w3, ((0, 0), (0, pad_n))).astype(jnp.bfloat16)
    b3p = jnp.pad(b3, ((0, 0), (0, pad_n)))
    # projector padded to full 128x128 MXU tiles; zero rows/cols contribute 0.
    wp1b = jnp.pad(wp1, ((0, pad_n), (0, pad_n))).astype(jnp.bfloat16)
    wp2b = jnp.pad(wp2, ((0, pad_n), (0, 0))).astype(jnp.bfloat16)
    return (w1b, b1, w2b, b2, w3b, b3p, wp1b, wp2b)


def _resident(arr):
    # Weights/biases keep a constant block index across the grid -> resident in
    # VMEM; single-buffer them so they don't burn a second pipeline buffer.
    return pl.BlockSpec(arr.shape, lambda i: (0, 0),
                        pipeline_mode=pl.Buffered(1))


@jax.jit
def cbir_forward(x, prepared_params):
    """x: [B, DENSENET_NUM_FEATURES] (f32 or bf16). prepared_params: from
    prepare_params().  Returns (sigmoid(output)[B, HASH_BITS], z[B, PROJ_DIM])."""
    B, F = x.shape
    assert F == DENSENET_NUM_FEATURES
    w1b, b1, w2b, b2, w3b, b3p, wp1b, wp2b = prepared_params

    # Feed bf16 tiles to the kernel (halves x DMA + its double buffer, removes
    # the in-kernel cast).  Producers holding bf16 features can pass them
    # directly and this cast disappears.
    if x.dtype != jnp.bfloat16:
        x = x.astype(jnp.bfloat16)

    # Batch tiling: cdiv + zero padding so any B works with big tiles.  For B a
    # multiple of 32 (<= 2*MAX_TB) the tiles divide B exactly -> no padding and
    # no post-kernel row-slice copy.
    tb = _choose_tb(B)
    n_tiles = pl.cdiv(B, tb)
    Bp = n_tiles * tb
    if Bp != B:
        x = jnp.pad(x, ((0, Bp - B), (0, 0)))

    grid_spec = pltpu.PrefetchScalarGridSpec(
        num_scalar_prefetch=0,
        grid=(n_tiles,),
        in_specs=[
            pl.BlockSpec((tb, F), lambda i: (i, 0)),          # x (batch-tiled)
            _resident(w1b), _resident(b1),
            _resident(w2b), _resident(b2),
            _resident(w3b), _resident(b3p),
            _resident(wp1b), _resident(wp2b),
        ],
        out_specs=[
            pl.BlockSpec((tb, HASH_PAD), lambda i: (i, 0)),   # sigmoid(output), padded
            pl.BlockSpec((tb, PROJ_DIM), lambda i: (i, 0)),   # z
        ],
    )

    hash_pad, z = pl.pallas_call(
        cbir_kernel,
        out_shape=(
            jax.ShapeDtypeStruct((Bp, HASH_PAD), jnp.float32),
            jax.ShapeDtypeStruct((Bp, PROJ_DIM), jnp.float32),
        ),
        grid_spec=grid_spec,
        compiler_params=pltpu.CompilerParams(
            dimension_semantics=("parallel",),
            # ~14 MiB worst case at tb=1024 (see header); fits every generation.
            vmem_limit_bytes=32 * 1024 * 1024,
        ),
    )(x, w1b, b1, w2b, b2, w3b, b3p, wp1b, wp2b)

    if Bp != B:                  # only pay the row-slice copy when we padded
        hash_pad = hash_pad[:B]
        z = z[:B]
    # Column slice back to HASH_BITS for module-faithful output; consumers that
    # can read the padded (B, 128) hash directly may skip this copy.
    return hash_pad[:, :HASH_BITS], z


# --- deterministic parameter init (mirrors init_weights / nn.Linear shapes) --
def _xavier_uniform(key, fan_in, fan_out):
    # torch.nn.init.xavier_uniform on weight of shape [out, in]; we store [in, out].
    limit = (6.0 / (fan_in + fan_out)) ** 0.5
    return jax.random.uniform(key, (fan_in, fan_out), jnp.float32, -limit, limit)


def init_params(key):
    k1, k2, k3, k4, k5 = jax.random.split(key, 5)
    w1 = _xavier_uniform(k1, DENSENET_NUM_FEATURES, 512)
    b1 = jnp.full((1, 512), 0.01, jnp.float32)          # bias.data.fill_(0.01)
    w2 = _xavier_uniform(k2, 512, 256)
    b2 = jnp.full((1, 256), 0.01, jnp.float32)
    w3 = _xavier_uniform(k3, 256, HASH_BITS)
    b3 = jnp.full((1, HASH_BITS), 0.01, jnp.float32)
    # projector Linears (bias=False); deterministic xavier-style init.
    wp1 = _xavier_uniform(k4, HASH_BITS, HASH_BITS)
    wp2 = _xavier_uniform(k5, HASH_BITS, PROJ_DIM)
    return (w1, b1, w2, b2, w3, b3, wp1, wp2)


def reference_forward(x, params):
    """Pure-JAX f32 reference for correctness checking."""
    w1, b1, w2, b2, w3, b3, wp1, wp2 = params
    h = _leaky_relu(x @ w1 + b1, MARGIN)
    h = _leaky_relu(h @ w2 + b2, MARGIN)
    logits = h @ w3 + b3
    z = jnp.maximum(logits @ wp1, 0.0) @ wp2
    return jax.nn.sigmoid(logits), z


if __name__ == "__main__":
    key = jax.random.PRNGKey(0)
    kx, kx2, kp = jax.random.split(key, 3)
    params = init_params(kp)
    prepped = prepare_params(params)        # one-time: bf16 cast + lane padding

    # B=64: multiple of 32 -> two equal 32-row tiles (balanced v7x megacore),
    # no row padding and no post-kernel row-slice copy.
    B = 64
    x = jax.random.normal(kx, (B, DENSENET_NUM_FEATURES), jnp.float32)
    hash_out, z_out = cbir_forward(x, prepped)
    jax.block_until_ready((hash_out, z_out))

    ref_hash, ref_z = reference_forward(x, params)
    assert hash_out.shape == (B, HASH_BITS) and z_out.shape == (B, PROJ_DIM)
    # bf16 matmul operands (f32 accumulation) -> relaxed tolerances vs f32 ref.
    assert jnp.allclose(hash_out, ref_hash, atol=2e-2, rtol=2e-2)
    assert jnp.allclose(z_out, ref_z, atol=8e-2, rtol=5e-2)

    # B=5: exercises the cdiv + zero-padding path (single 16-row tile).
    B2 = 5
    x2 = jax.random.normal(kx2, (B2, DENSENET_NUM_FEATURES), jnp.float32)
    hash2, z2 = cbir_forward(x2, prepped)
    jax.block_until_ready((hash2, z2))

    ref_hash2, ref_z2 = reference_forward(x2, params)
    assert hash2.shape == (B2, HASH_BITS) and z2.shape == (B2, PROJ_DIM)
    assert jnp.allclose(hash2, ref_hash2, atol=2e-2, rtol=2e-2)
    assert jnp.allclose(z2, ref_z2, atol=8e-2, rtol=5e-2)

    print("KERNEL_OK")
</pallas_src>

<mosaic_0001>
module attributes {stable_mosaic.version = 11 : i64} {
  func.func @cbir_kernel(%arg0: i32, %arg1: memref<32x1024xbf16, #tpu.memory_space<vmem>>, %arg2: memref<1024x512xbf16, #tpu.memory_space<vmem>>, %arg3: memref<1x512xf32, #tpu.memory_space<vmem>>, %arg4: memref<512x256xbf16, #tpu.memory_space<vmem>>, %arg5: memref<1x256xf32, #tpu.memory_space<vmem>>, %arg6: memref<256x128xbf16, #tpu.memory_space<vmem>>, %arg7: memref<1x128xf32, #tpu.memory_space<vmem>>, %arg8: memref<128x128xbf16, #tpu.memory_space<vmem>>, %arg9: memref<128x128xbf16, #tpu.memory_space<vmem>>, %arg10: memref<32x128xf32, #tpu.memory_space<vmem>>, %arg11: memref<32x128xf32, #tpu.memory_space<vmem>>) attributes {dimension_semantics = [#tpu.dimension_semantics<parallel>], iteration_bounds = array<i64: 2>, scalar_prefetch = 0 : i64, scratch_operands = 0 : i64, tpu.core_type = #tpu.core_type<tc>, window_params = [{transform_indices = @transform_0, window_bounds = array<i64: 32, 1024>}, {pipeline_mode = #tpu.pipeline_mode<synchronous>, transform_indices = @transform_1, window_bounds = array<i64: 1024, 512>}, {pipeline_mode = #tpu.pipeline_mode<synchronous>, transform_indices = @transform_2, window_bounds = array<i64: 1, 512>}, {pipeline_mode = #tpu.pipeline_mode<synchronous>, transform_indices = @transform_3, window_bounds = array<i64: 512, 256>}, {pipeline_mode = #tpu.pipeline_mode<synchronous>, transform_indices = @transform_4, window_bounds = array<i64: 1, 256>}, {pipeline_mode = #tpu.pipeline_mode<synchronous>, transform_indices = @transform_5, window_bounds = array<i64: 256, 128>}, {pipeline_mode = #tpu.pipeline_mode<synchronous>, transform_indices = @transform_6, window_bounds = array<i64: 1, 128>}, {pipeline_mode = #tpu.pipeline_mode<synchronous>, transform_indices = @transform_7, window_bounds = array<i64: 128, 128>}, {pipeline_mode = #tpu.pipeline_mode<synchronous>, transform_indices = @transform_8, window_bounds = array<i64: 128, 128>}, {transform_indices = @transform_9, window_bounds = array<i64: 32, 128>}, {transform_indices = @transform_10, window_bounds = array<i64: 32, 128>}]} {
    %c0 = arith.constant 0 : index
    %c0_0 = arith.constant 0 : index
    %0 = vector.load %arg1[%c0, %c0_0] : memref<32x1024xbf16, #tpu.memory_space<vmem>>, vector<32x1024xbf16>
    %c0_1 = arith.constant 0 : index
    %c0_2 = arith.constant 0 : index
    %1 = vector.load %arg2[%c0_1, %c0_2] : memref<1024x512xbf16, #tpu.memory_space<vmem>>, vector<1024x512xbf16>
    %cst = arith.constant dense<0.000000e+00> : vector<32x512xf32>
    %2 = tpu.matmul %0, %1, %cst {dimension_numbers = #tpu.dot_dimension_numbers<[1], [0], [0], [1], [0, 0, 1, 1], [], []>} : vector<32x1024xbf16>, vector<1024x512xbf16>, vector<32x512xf32> -> vector<32x512xf32>
    %c0_3 = arith.constant 0 : index
    %c0_4 = arith.constant 0 : index
    %3 = vector.load %arg3[%c0_3, %c0_4] : memref<1x512xf32, #tpu.memory_space<vmem>>, vector<1x512xf32>
    %4 = vector.broadcast %3 : vector<1x512xf32> to vector<32x512xf32>
    %5 = arith.addf %2, %4 : vector<32x512xf32>
    %cst_5 = arith.constant 0.000000e+00 : f32
    %6 = vector.broadcast %cst_5 : f32 to vector<32x512xf32>
    %7 = arith.cmpf ogt, %5, %6 : vector<32x512xf32>
    %cst_6 = arith.constant 5.000000e-01 : f32
    %8 = vector.broadcast %cst_6 : f32 to vector<32x512xf32>
    %9 = arith.mulf %8, %5 : vector<32x512xf32>
    %10 = arith.select %7, %5, %9 : vector<32x512xi1>, vector<32x512xf32>
    %11 = arith.truncf %10 : vector<32x512xf32> to vector<32x512xbf16>
    %c0_7 = arith.constant 0 : index
    %c0_8 = arith.constant 0 : index
    %12 = vector.load %arg4[%c0_7, %c0_8] : memref<512x256xbf16, #tpu.memory_space<vmem>>, vector<512x256xbf16>
    %cst_9 = arith.constant dense<0.000000e+00> : vector<32x256xf32>
    %13 = tpu.matmul %11, %12, %cst_9 {dimension_numbers = #tpu.dot_dimension_numbers<[1], [0], [0], [1], [0, 0, 1, 1], [], []>} : vector<32x512xbf16>, vector<512x256xbf16>, vector<32x256xf32> -> vector<32x256xf32>
    %c0_10 = arith.constant 0 : index
    %c0_11 = arith.constant 0 : index
    %14 = vector.load %arg5[%c0_10, %c0_11] : memref<1x256xf32, #tpu.memory_space<vmem>>, vector<1x256xf32>
    %15 = vector.broadcast %14 : vector<1x256xf32> to vector<32x256xf32>
    %16 = arith.addf %13, %15 : vector<32x256xf32>
    %cst_12 = arith.constant 0.000000e+00 : f32
    %17 = vector.broadcast %cst_12 : f32 to vector<32x256xf32>
    %18 = arith.cmpf ogt, %16, %17 : vector<32x256xf32>
    %cst_13 = arith.constant 5.000000e-01 : f32
    %19 = vector.broadcast %cst_13 : f32 to vector<32x256xf32>
    %20 = arith.mulf %19, %16 : vector<32x256xf32>
    %21 = arith.select %18, %16, %20 : vector<32x256xi1>, vector<32x256xf32>
    %22 = arith.truncf %21 : vector<32x256xf32> to vector<32x256xbf16>
    %c0_14 = arith.constant 0 : index
    %c0_15 = arith.constant 0 : index
    %23 = vector.load %arg6[%c0_14, %c0_15] : memref<256x128xbf16, #tpu.memory_space<vmem>>, vector<256x128xbf16>
    %cst_16 = arith.constant dense<0.000000e+00> : vector<32x128xf32>
    %24 = tpu.matmul %22, %23, %cst_16 {dimension_numbers = #tpu.dot_dimension_numbers<[1], [0], [0], [1], [0, 0, 1, 1], [], []>} : vector<32x256xbf16>, vector<256x128xbf16>, vector<32x128xf32> -> vector<32x128xf32>
    %c0_17 = arith.constant 0 : index
    %c0_18 = arith.constant 0 : index
    %25 = vector.load %arg7[%c0_17, %c0_18] : memref<1x128xf32, #tpu.memory_space<vmem>>, vector<1x128xf32>
    %26 = vector.broadcast %25 : vector<1x128xf32> to vector<32x128xf32>
    %27 = arith.addf %24, %26 : vector<32x128xf32>
    %28 = arith.negf %27 : vector<32x128xf32>
    %29 = math.exp %28 : vector<32x128xf32>
    %cst_19 = arith.constant 1.000000e+00 : f32
    %30 = vector.broadcast %cst_19 : f32 to vector<32x128xf32>
    %31 = arith.addf %30, %29 : vector<32x128xf32>
    %32 = arith.divf %30, %31 : vector<32x128xf32>
    %c0_20 = arith.constant 0 : index
    %c0_21 = arith.constant 0 : index
    %33 = vector.load %arg10[%c0_20, %c0_21] : memref<32x128xf32, #tpu.memory_space<vmem>>, vector<32x128xf32>
    tpu.vector_store %arg10[%c0_20, %c0_21], %32 {strides = array<i32>} : memref<32x128xf32, #tpu.memory_space<vmem>>, vector<32x128xf32>,
    %34 = arith.truncf %27 : vector<32x128xf32> to vector<32x128xbf16>
    %c0_22 = arith.constant 0 : index
    %c0_23 = arith.constant 0 : index
    %35 = vector.load %arg8[%c0_22, %c0_23] : memref<128x128xbf16, #tpu.memory_space<vmem>>, vector<128x128xbf16>
    %cst_24 = arith.constant dense<0.000000e+00> : vector<32x128xf32>
    %36 = tpu.matmul %34, %35, %cst_24 {dimension_numbers = #tpu.dot_dimension_numbers<[1], [0], [0], [1], [0, 0, 1, 1], [], []>} : vector<32x128xbf16>, vector<128x128xbf16>, vector<32x128xf32> -> vector<32x128xf32>
    %cst_25 = arith.constant 0.000000e+00 : f32
    %37 = vector.broadcast %cst_25 : f32 to vector<32x128xf32>
    %38 = arith.maximumf %36, %37 : vector<32x128xf32>
    %39 = arith.truncf %38 : vector<32x128xf32> to vector<32x128xbf16>
    %c0_26 = arith.constant 0 : index
    %c0_27 = arith.constant 0 : index
    %40 = vector.load %arg9[%c0_26, %c0_27] : memref<128x128xbf16, #tpu.memory_space<vmem>>, vector<128x128xbf16>
    %cst_28 = arith.constant dense<0.000000e+00> : vector<32x128xf32>
    %41 = tpu.matmul %39, %40, %cst_28 {dimension_numbers = #tpu.dot_dimension_numbers<[1], [0], [0], [1], [0, 0, 1, 1], [], []>} : vector<32x128xbf16>, vector<128x128xbf16>, vector<32x128xf32> -> vector<32x128xf32>
    %c0_29 = arith.constant 0 : index
    %c0_30 = arith.constant 0 : index
    %42 = vector.load %arg11[%c0_29, %c0_30] : memref<32x128xf32, #tpu.memory_space<vmem>>, vector<32x128xf32>
    tpu.vector_store %arg11[%c0_29, %c0_30], %41 {strides = array<i32>} : memref<32x128xf32, #tpu.memory_space<vmem>>, vector<32x128xf32>,
    return
  }
  func.func @transform_0(%arg0: i32) -> (i32, i32) {
    %c0_i32 = arith.constant 0 : i32
    %c0_i32_0 = arith.constant 0 : i32
    return %arg0, %c0_i32 : i32, i32
  }
  func.func @transform_1(%arg0: i32) -> (i32, i32) {
    %c0_i32 = arith.constant 0 : i32
    %c0_i32_0 = arith.constant 0 : i32
    %c0_i32_1 = arith.constant 0 : i32
    return %c0_i32, %c0_i32_0 : i32, i32
  }
  func.func @transform_2(%arg0: i32) -> (i32, i32) {
    %c0_i32 = arith.constant 0 : i32
    %c0_i32_0 = arith.constant 0 : i32
    %c0_i32_1 = arith.constant 0 : i32
    return %c0_i32, %c0_i32_0 : i32, i32
  }
  func.func @transform_3(%arg0: i32) -> (i32, i32) {
    %c0_i32 = arith.constant 0 : i32
    %c0_i32_0 = arith.constant 0 : i32
    %c0_i32_1 = arith.constant 0 : i32
    return %c0_i32, %c0_i32_0 : i32, i32
  }
  func.func @transform_4(%arg0: i32) -> (i32, i32) {
    %c0_i32 = arith.constant 0 : i32
    %c0_i32_0 = arith.constant 0 : i32
    %c0_i32_1 = arith.constant 0 : i32
    return %c0_i32, %c0_i32_0 : i32, i32
  }
  func.func @transform_5(%arg0: i32) -> (i32, i32) {
    %c0_i32 = arith.constant 0 : i32
    %c0_i32_0 = arith.constant 0 : i32
    %c0_i32_1 = arith.constant 0 : i32
    return %c0_i32, %c0_i32_0 : i32, i32
  }
  func.func @transform_6(%arg0: i32) -> (i32, i32) {
    %c0_i32 = arith.constant 0 : i32
    %c0_i32_0 = arith.constant 0 : i32
    %c0_i32_1 = arith.constant 0 : i32
    return %c0_i32, %c0_i32_0 : i32, i32
  }
  func.func @transform_7(%arg0: i32) -> (i32, i32) {
    %c0_i32 = arith.constant 0 : i32
    %c0_i32_0 = arith.constant 0 : i32
    %c0_i32_1 = arith.constant 0 : i32
    return %c0_i32, %c0_i32_0 : i32, i32
  }
  func.func @transform_8(%arg0: i32) -> (i32, i32) {
    %c0_i32 = arith.constant 0 : i32
    %c0_i32_0 = arith.constant 0 : i32
    %c0_i32_1 = arith.constant 0 : i32
    return %c0_i32, %c0_i32_0 : i32, i32
  }
  func.func @transform_9(%arg0: i32) -> (i32, i32) {
    %c0_i32 = arith.constant 0 : i32
    %c0_i32_0 = arith.constant 0 : i32
    return %arg0, %c0_i32 : i32, i32
  }
  func.func @transform_10(%arg0: i32) -> (i32, i32) {
    %c0_i32 = arith.constant 0 : i32
    %c0_i32_0 = arith.constant 0 : i32
    return %arg0, %c0_i32 : i32, i32
  }
}

</mosaic_0001>

<bundles_post_ra>
// kernel: cbir_forward.1
= control target key start
LH: loop header
LB: loop body
LE: loop exit
PB: predicated region body
PF: predicated region fallthrough
CT: control target
= control target key end

     0   :  { %s5596_s0 = inlined_call_operand.vmem [shape: bf16[64,1024], index: 0, kind: input, shape index: {}]   ;;  %s5597_s1 = inlined_call_operand.hbm [shape: bf16[1024,512], index: 1, kind: input, shape index: {}]   ;;  %s5598_s2 = inlined_call_operand.vmem [shape: f32[1,512], index: 2, kind: input, shape index: {}]   ;;  %s5599_s3 = inlined_call_operand.vmem [shape: bf16[512,256], index: 3, kind: input, shape index: {}]   ;;  %s5600_s4 = inlined_call_operand.vmem [shape: f32[1,256], index: 4, kind: input, shape index: {}]   ;;  %s5601_s5 = inlined_call_operand.vmem [shape: bf16[256,128], index: 5, kind: input, shape index: {}]   ;;  %s5602_s6 = inlined_call_operand.vmem [shape: f32[1,128], index: 6, kind: input, shape index: {}]   ;;  %s5603_s7 = inlined_call_operand.vmem [shape: bf16[128,128], index: 7, kind: input, shape index: {}]   ;;  %s5604_s8 = inlined_call_operand.vmem [shape: bf16[128,128], index: 8, kind: input, shape index: {}]   ;;  %s5605_s9 = inlined_call_operand.hbm [shape: f32[64,128], index: 9, kind: output, shape index: {0}]   ;;  %s5606_s10 = inlined_call_operand.hbm [shape: f32[64,128], index: 10, kind: output, shape index: {1}]  }
   0x1   :  { %5613 = sst [smem:[#allocation11_spill]] %s5596_s0 }
   0x2   :  { %5614 = sst [smem:[#allocation12_spill]] %s5597_s1 }
   0x3   :  { %16 = vsyncpa [#allocation3], 0 }
   0x4   :  { %17 = vsyncpa [#allocation4], 0 }
   0x5   :  { %19 = vsyncpa [#allocation4 + $0x1], 0 }
   0x6   :  { %20 = vsyncpa [#allocation7], 0 }
   0x7   :  { %22 = vsyncpa [#allocation7 + $0x1], 0  ;;  %s4987_s13 = smov 0   ;;  %s4989_s14 = smov 0  }
   0x8   :  { %s4991_s15 = smov 0   ;;  %s4993_s16 = smov 0  }
   0x9 LB: > { %s5008_s17 = sadd.s32 4294967295, %s4923_s16   ;;  %s3647_s18 = sadd.s32 4294967294, %s4923_s16   ;;  %s4923_s16 = sphi %s4993_s16, %s5633_s16   ;;  %s4919_s15 = sphi %s4991_s15, %s5632_s15   ;;  %s4915_s14 = sphi %s4989_s14, %s5631_s14   ;;  %s4911_s13 = sphi %s4987_s13, %s5630_s13  }
   0xa   : > { %s5012_s19 = sadd.s32 1, %s4923_s16   ;;  %s229_s20 = sadd.s32 1, %s4919_s15 }
   0xb   : > { %s226_s21 = ssub.s32 %s4923_s16, %s5012_s19  ;;  %p239_p0 = scmp.ne.s32.totalorder %s4919_s15, %s4915_s14 }
   0xc   : > { %p227_p1 = scmp.eq.s32.totalorder %s226_s21, 0  ;;  %p240_p2 = scmp.eq.s32.totalorder %s5008_s17, 1 }
   0xd   : > { %p245_p3 = scmp.ne.s32.totalorder %s4915_s14, %s4911_s13  ;;  %p246_p4 = scmp.eq.s32.totalorder %s3647_s18, 1 }
   0xe   : > { %s5023_s22 = scalar_select %p227_p1, %s4919_s15, %s229_s20  }
   0xf   : > { %p5025_p5 = por %p240_p2, %p239_p0  ;;  %p5029_p6 = por %p246_p4, %p245_p3 }
  0x10   : > { %p3648_p7 = scmp.ge.s32.totalorder %s4923_s16, 1  ;;  %p279_p8 = scmp.lt.s32.totalorder %s4923_s16, 3 }
  0x11   : > { %s5615_s23 = scalar_select %p5025_p5, 1, 0 }
  0x12   : > { %s5616_s24 = scalar_select %p5029_p6, 1, 0 }
  0x13   : > { %p5607_p9 = scmp.eq.s32.totalorder %s5008_s17, 0  ;;  %p5036_p10 = pnand %p3648_p7, %p279_p8 }
  0x14   : > { %s4925_s26 = smov [#allocation2]   ;;  %s5619_s1 = sld [smem:[#allocation12_spill]] }
  0x15   : > { %s5617_s25 = scalar_select %p5036_p10, 1, 0 }
  0x16   : > { %s291_s27 = sshll.u32 %s4925_s26, 4  ;;  %p4218_p11 = pneg %p5036_p10  ;;  %s292_s27 = int_to_ptr.vmem [resolvable:$true] %s291_s27 }
  0x18   : > { %p5044_p12 = pnand %p5607_p9, %p4218_p11 }
  0x1a   : > { %s4797_s11 = scalar_lea.hbm %s5619_s1, 32768  ;;  %p4799_p0 = pneg %p5044_p12 }
  0x1b   : > { %p4798_p13 = scmp.ne.s32.totalorder %s5619_s1, %s4797_s11  ;;  %p4804_p3 = scmp.lt.u32.totalorder %s4797_s11, %s5619_s1 }
  0x1d   : > { %p4800_p1 = pnand %p4799_p0, %p4798_p13 }
  0x1f   : > { %p4801_p2 = pneg %p4800_p1 }
  0x21   : > { %p4806_p4 = pnand %p4804_p3, %p4801_p2 }
  0x23   : > { %4809 = shalt.err (!%p4806_p4)
}
  0x24   : > { %s4810_s26 = scalar_lea.vmem %s292_s27, 32768  ;;  %p4818_p9 = scmp.lt.s32.totalorder %s292_s27, %s292_s27 }
  0x25   : > { %p4811_p7 = scmp.ne.s32.totalorder %s292_s27, %s4810_s26  ;;  %p4819_p6 = scmp.lt.s32.totalorder %s4810_s26, %s4810_s26 }
  0x27   : > { %p4813_p8 = pnand %p4811_p7, %p4799_p0  ;;  %p4820_p5 = por %p4819_p6, %p4818_p9 }
  0x29   : > { %p4814_p11 = pneg %p4813_p8 }
  0x2b   : > { %p4821_p10 = pnand %p4820_p5, %p4814_p11 }
  0x2d   : > { %4824 = shalt.err (!%p4821_p10)
}
  0x2e   : > { %s4926_s29 = smov 256   ;;  %s4927_s30 = smov 16  }
  0x2f   : > { %4221 = dma.hbm_to_vmem [thread:$0]  (!%p5044_p12), %s5619_s1, 32768, %s292_s27, [#allocation3], %s4926_s29, %s4926_s29, %s4927_s30  }
  0x30   : > { %p5620_p13 = scmp.ne.s32.totalorder %s5617_s25, 0 }
  0x31   : > { %p5621_p1 = scmp.eq.s32.totalorder (!%p5620_p13), %s5008_s17, 0 }
  0x32   : > { %338 = sbr.rel (%p5620_p13) target bundleno = 1511 (0x5e7), region = 56 }
  0x39   : > { %4898 = dma.done.wait (%p5621_p1), [#allocation3], 32768   ;;  %p5622_p0 = pmov %p5621_p1 }
  0x3a   : > { %v4269_v0 = vld [vmem:[#allocation2 + $0x4] ss:$16 sps:$4 sm:$0xff]   ;;  %v4271_v1 = vld [vmem:[#allocation2 + $0xc] ss:$16 sps:$4 sm:$0xff]   ;;  %v4273_v2 = vld [vmem:[#allocation2] ss:$16 sps:$4 sm:$0xff]  }
  0x3b   : > { %4900 = vsyncadd (%p5622_p0), [#allocation3], 4294934528  ;;  %2046 = vmatprep.subr.bf16.mxu0 %v4269_v0  ;;  %v4274_v3 = vld [vmem:[#allocation2 + $0x8] ss:$16 sps:$4 sm:$0xff]   ;;  %2258 = vmatprep.subr.bf16.mxu1 %v4271_v1  ;;  %v4275_v4 = vld [vmem:[#allocation2 + $0x24] ss:$16 sps:$4 sm:$0xff]  }
  0x3c   : > { %2047 = vmatpush1.bf16.msra.mxu0 %v4273_v2  ;;  %2259 = vmatpush1.bf16.msra.mxu1 %v4274_v3  ;;  %v4277_v5 = vld [vmem:[#allocation2 + $0x2c] ss:$16 sps:$4 sm:$0xff]   ;;  %v4279_v6 = vld [vmem:[#allocation2 + $0x20] ss:$16 sps:$4 sm:$0xff]   ;;  %v4280_v7 = vld [vmem:[#allocation2 + $0x28] ss:$16 sps:$4 sm:$0xff]  }
  0x3d   : > { %2048 = vmatprep.subr.bf16.mxu0 %v4275_v4  ;;  %2260 = vmatprep.subr.bf16.mxu1 %v4277_v5  ;;  %v4281_v8 = vld [vmem:[#allocation2 + $0x44] ss:$16 sps:$4 sm:$0xff]   ;;  %v4283_v9 = vld [vmem:[#allocation2 + $0x4c] ss:$16 sps:$4 sm:$0xff]   ;;  %v4285_v10 = vld [vmem:[#allocation2 + $0x40] ss:$16 sps:$4 sm:$0xff]  }
  0x3e   : > { %v4286_v11 = vld [vmem:[#allocation2 + $0x48] ss:$16 sps:$4 sm:$0xff]   ;;  %v4287_v12 = vld [vmem:[#allocation2 + $0x64] ss:$16 sps:$4 sm:$0xff]   ;;  %v4289_v13 = vld [vmem:[#allocation2 + $0x6c] ss:$16 sps:$4 sm:$0xff]  }
  0x3f   : > { %v4291_v14 = vld [vmem:[#allocation2 + $0x60] ss:$16 sps:$4 sm:$0xff]   ;;  %v4292_v15 = vld [vmem:[#allocation2 + $0x68] ss:$16 sps:$4 sm:$0xff]   ;;  %v4293_v16 = vld [vmem:[#allocation2 + $0x84] ss:$16 sps:$4 sm:$0xff]  }
  0x40   : > { %2049 = vmatpush1.bf16.msra.mxu0 %v4279_v6  ;;  %2261 = vmatpush1.bf16.msra.mxu1 %v4280_v7  ;;  %v4295_v17 = vld [vmem:[#allocation2 + $0x8c] ss:$16 sps:$4 sm:$0xff]   ;;  %v4297_v18 = vld [vmem:[#allocation2 + $0x80] ss:$16 sps:$4 sm:$0xff]   ;;  %v4298_v19 = vld [vmem:[#allocation2 + $0x88] ss:$16 sps:$4 sm:$0xff]  }
  0x41   : > { %2050 = vmatprep.subr.bf16.mxu0 %v4281_v8  ;;  %2262 = vmatprep.subr.bf16.mxu1 %v4283_v9  ;;  %v4299_v20 = vld [vmem:[#allocation2 + $0xa4] ss:$16 sps:$4 sm:$0xff]   ;;  %v4301_v21 = vld [vmem:[#allocation2 + $0xac] ss:$16 sps:$4 sm:$0xff]   ;;  %v4303_v22 = vld [vmem:[#allocation2 + $0xa0] ss:$16 sps:$4 sm:$0xff]  }
  0x42   : > { %v4304_v23 = vld [vmem:[#allocation2 + $0xa8] ss:$16 sps:$4 sm:$0xff]   ;;  %v4305_v24 = vld [vmem:[#allocation2 + $0xc4] ss:$16 sps:$4 sm:$0xff]   ;;  %v4307_v25 = vld [vmem:[#allocation2 + $0xcc] ss:$16 sps:$4 sm:$0xff]  }
  0x43   : > { %v4309_v26 = vld [vmem:[#allocation2 + $0xc0] ss:$16 sps:$4 sm:$0xff]   ;;  %v4310_v27 = vld [vmem:[#allocation2 + $0xc8] ss:$16 sps:$4 sm:$0xff]   ;;  %v4311_v28 = vld [vmem:[#allocation2 + $0xe4] ss:$16 sps:$4 sm:$0xff]  }
  0x44   : > { %2051 = vmatpush1.bf16.msra.mxu0 %v4285_v10  ;;  %2263 = vmatpush1.bf16.msra.mxu1 %v4286_v11  ;;  %v4313_v29 = vld [vmem:[#allocation2 + $0xec] ss:$16 sps:$4 sm:$0xff]   ;;  %s3655_s25 = sshll.u32 %s5008_s17, 2  ;;  %v4315_v30 = vld [vmem:[#allocation2 + $0xe0] ss:$16 sps:$4 sm:$0xff]   ;;  %s5623_s0 = sld [smem:[#allocation11_spill]] }
  0x45   : > { %2052 = vmatprep.subr.bf16.mxu0 %v4287_v12  ;;  %2264 = vmatprep.subr.bf16.mxu1 %v4289_v13  ;;  %v4316_v31 = vld [vmem:[#allocation2 + $0xe8] ss:$16 sps:$4 sm:$0xff]   ;;  %v4317_v32 = vld [vmem:[#allocation2 + $0x104] ss:$16 sps:$4 sm:$0xff]   ;;  %p383_p5 = scmp.lt.s32.totalorder %s3655_s25, 7  ;;  %s5477_s26 = sand.u32 1, %s4915_s14  }
  0x46   : > { %v4319_v33 = vld [vmem:[#allocation2 + $0x10c] ss:$16 sps:$4 sm:$0xff]   ;;  %v4321_v34 = vld [vmem:[#allocation2 + $0x100] ss:$16 sps:$4 sm:$0xff]   ;;  %v4322_v35 = vld [vmem:[#allocation2 + $0x108] ss:$16 sps:$4 sm:$0xff]  }
  0x47   : > { %v4323_v36 = vld [vmem:[#allocation2 + $0x124] ss:$16 sps:$4 sm:$0xff]   ;;  %s5635_s25 = smov (!%p383_p5, %s3655_s25), 7  ;;  %v4325_v37 = vld [vmem:[#allocation2 + $0x12c] ss:$16 sps:$4 sm:$0xff]   ;;  %s5610_s12 = sshll.u32 %s5477_s26, 5 }
  0x48   : > { %2053 = vmatpush1.bf16.msra.mxu0 %v4291_v14  ;;  %2265 = vmatpush1.bf16.msra.mxu1 %v4292_v15  ;;  %v4327_v38 = vld [vmem:[#allocation2 + $0x120] ss:$16 sps:$4 sm:$0xff]   ;;  %v4328_v39 = vld [vmem:[#allocation2 + $0x128] ss:$16 sps:$4 sm:$0xff]   ;;  %v4329_v40 = vld [vmem:[#allocation2 + $0x144] ss:$16 sps:$4 sm:$0xff]  }
  0x49   : > { %2054 = vmatprep.subr.bf16.mxu0 %v4293_v16  ;;  %2266 = vmatprep.subr.bf16.mxu1 %v4295_v17  ;;  %s4039_s27 = sshll.u32 %s5635_s25, 5  ;;  %v4331_v41 = vld [vmem:[#allocation2 + $0x14c] ss:$16 sps:$4 sm:$0xff]   ;;  %v4333_v42 = vld [vmem:[#allocation2 + $0x140] ss:$16 sps:$4 sm:$0xff]   ;;  %s5491_s11 = scalar_lea.vmem [#allocation5], %s5610_s12 }
  0x4a   : > { %v4334_v43 = vld [vmem:[#allocation2 + $0x148] ss:$16 sps:$4 sm:$0xff]   ;;  %s5074_s20 = scalar_lea.vmem %s5623_s0, %s4039_s27  ;;  %v4335_v44 = vld [vmem:[#allocation2 + $0x164] ss:$16 sps:$4 sm:$0xff]   ;;  %v4337_v45 = vld [vmem:[#allocation2 + $0x16c] ss:$16 sps:$4 sm:$0xff]  }
  0x4b   : > { %v392_v46 = vld [vmem:[%s5074_s20] sm:$0xff]  ;;  %v4340_v49 = vld [vmem:[#allocation2 + $0x168] ss:$16 sps:$4 sm:$0xff]   ;;  %v4343_v52 = vld [vmem:[#allocation2 + $0x18c] ss:$16 sps:$4 sm:$0xff]   ;;  %s3525_s18 = sshll.u32 %s5491_s11, 4  ;;  %s5504_s18 = int_to_ptr.vmem [resolvable:$true] %s3525_s18 }
  0x4c   : > { %2055 = vmatpush1.bf16.msra.mxu0 %v4297_v18  ;;  %2267 = vmatpush1.bf16.msra.mxu1 %v4298_v19  ;;  %v396_v47 = vld [vmem:[%s5074_s20 + $0x20] sm:$0xff]  ;;  %v4346_v54 = vld [vmem:[#allocation2 + $0x188] ss:$16 sps:$4 sm:$0xff]   ;;  %v4349_v56 = vld [vmem:[#allocation2 + $0x1ac] ss:$16 sps:$4 sm:$0xff]   ;;  %s5611_s25 = sshll.u32 %s5008_s17, 9 }
  0x4d   : > { %2056 = vmatprep.subr.bf16.mxu0 %v4299_v20  ;;  %2268 = vmatprep.subr.bf16.mxu1 %v4301_v21  ;;  %v4339_v48 = vld [vmem:[#allocation2 + $0x160] ss:$16 sps:$4 sm:$0xff]   ;;  %v3659_v50 = vcombine.high %v392_v46, %v396_v47  ;;  %v4341_v51 = vld [vmem:[#allocation2 + $0x184] ss:$16 sps:$4 sm:$0xff]   ;;  %v4352_v58 = vld [vmem:[#allocation2 + $0x1a8] ss:$16 sps:$4 sm:$0xff]   ;;  %v3658_v5 = vcombine.low %v392_v46, %v396_v47 }
  0x4e   : > { %v4345_v53 = vld [vmem:[#allocation2 + $0x180] ss:$16 sps:$4 sm:$0xff]   ;;  %v4347_v55 = vld [vmem:[#allocation2 + $0x1a4] ss:$16 sps:$4 sm:$0xff]   ;;  %v4355_v60 = vld [vmem:[#allocation2 + $0x1cc] ss:$16 sps:$4 sm:$0xff]  }
  0x4f   : > { %2078 = vmatprep.mubr.bf16.mxu0 %v3659_v50  ;;  %2290 = vmatprep.mubr.bf16.mxu1 %v3659_v50  ;;  %v4351_v57 = vld [vmem:[#allocation2 + $0x1a0] ss:$16 sps:$4 sm:$0xff]   ;;  %v4353_v59 = vld [vmem:[#allocation2 + $0x1c4] ss:$16 sps:$4 sm:$0xff]   ;;  %v4358_v62 = vld [vmem:[#allocation2 + $0x1c8] ss:$16 sps:$4 sm:$0xff]  }
  0x50   : > { %2057 = vmatpush1.bf16.msra.mxu0 %v4303_v22  ;;  %2269 = vmatpush1.bf16.msra.mxu1 %v4304_v23  ;;  %v4357_v61 = vld [vmem:[#allocation2 + $0x1c0] ss:$16 sps:$4 sm:$0xff]   ;;  %v4359_v63 = vld [vmem:[#allocation2 + $0x1e4] ss:$16 sps:$4 sm:$0xff]   ;;  %v4361_v0 = vld [vmem:[#allocation2 + $0x1ec] ss:$16 sps:$4 sm:$0xff]  }
  0x51   : > { %2058 = vmatprep.subr.bf16.mxu0 %v4305_v24  ;;  %2270 = vmatprep.subr.bf16.mxu1 %v4307_v25  ;;  %v4363_v1 = vld [vmem:[#allocation2 + $0x1e0] ss:$16 sps:$4 sm:$0xff]   ;;  %v4364_v2 = vld [vmem:[#allocation2 + $0x1e8] ss:$16 sps:$4 sm:$0xff]   ;;  %v4367_v3 = vld [vmem:[#allocation2 + $0x204] ss:$16 sps:$4 sm:$0xff]  }
  0x52   : > { %v4370_v4 = vld [vmem:[#allocation2 + $0x20c] ss:$16 sps:$4 sm:$0xff]   ;;  %v4365_v6 = vld [vmem:[#allocation2 + $0x200] ss:$16 sps:$4 sm:$0xff]   ;;  %v4368_v7 = vld [vmem:[#allocation2 + $0x208] ss:$16 sps:$4 sm:$0xff]  }
  0x53   : > { %v4373_v8 = vld [vmem:[#allocation2 + $0x224] ss:$16 sps:$4 sm:$0xff]   ;;  %v4376_v9 = vld [vmem:[#allocation2 + $0x22c] ss:$16 sps:$4 sm:$0xff]   ;;  %v4371_v10 = vld [vmem:[#allocation2 + $0x220] ss:$16 sps:$4 sm:$0xff]  }
  0x54   : > { %2059 = vmatpush1.bf16.msra.mxu0 %v4309_v26  ;;  %2271 = vmatpush1.bf16.msra.mxu1 %v4310_v27  ;;  %v4374_v11 = vld [vmem:[#allocation2 + $0x228] ss:$16 sps:$4 sm:$0xff]   ;;  %v4379_v12 = vld [vmem:[#allocation2 + $0x244] ss:$16 sps:$4 sm:$0xff]   ;;  %v4382_v13 = vld [vmem:[#allocation2 + $0x24c] ss:$16 sps:$4 sm:$0xff]  }
  0x55   : > { %2060 = vmatprep.subr.bf16.mxu0 %v4311_v28  ;;  %2272 = vmatprep.subr.bf16.mxu1 %v4313_v29  ;;  %v4377_v14 = vld [vmem:[#allocation2 + $0x240] ss:$16 sps:$4 sm:$0xff]   ;;  %v4380_v15 = vld [vmem:[#allocation2 + $0x248] ss:$16 sps:$4 sm:$0xff]   ;;  %v4385_v16 = vld [vmem:[#allocation2 + $0x264] ss:$16 sps:$4 sm:$0xff]  }
  0x56   : > { %v4388_v17 = vld [vmem:[#allocation2 + $0x26c] ss:$16 sps:$4 sm:$0xff]   ;;  %v4383_v18 = vld [vmem:[#allocation2 + $0x260] ss:$16 sps:$4 sm:$0xff]   ;;  %v4386_v19 = vld [vmem:[#allocation2 + $0x268] ss:$16 sps:$4 sm:$0xff]  }
  0x57   : > { %v4391_v20 = vld [vmem:[#allocation2 + $0x284] ss:$16 sps:$4 sm:$0xff]   ;;  %v4394_v21 = vld [vmem:[#allocation2 + $0x28c] ss:$16 sps:$4 sm:$0xff]   ;;  %v4389_v22 = vld [vmem:[#allocation2 + $0x280] ss:$16 sps:$4 sm:$0xff]  }
  0x58   : > { %2061 = vmatpush1.bf16.msra.mxu0 %v4315_v30  ;;  %2273 = vmatpush1.bf16.msra.mxu1 %v4316_v31  ;;  %v4392_v23 = vld [vmem:[#allocation2 + $0x288] ss:$16 sps:$4 sm:$0xff]   ;;  %v4397_v24 = vld [vmem:[#allocation2 + $0x2a4] ss:$16 sps:$4 sm:$0xff]   ;;  %v4400_v25 = vld [vmem:[#allocation2 + $0x2ac] ss:$16 sps:$4 sm:$0xff]  }
  0x59   : > { %2062 = vmatprep.subr.bf16.mxu0 %v4317_v32  ;;  %2274 = vmatprep.subr.bf16.mxu1 %v4319_v33  ;;  %v400_v26 = vld [vmem:[%s5074_s20 + $0x40] sm:$0xff]  ;;  %v4398_v30 = vld [vmem:[#allocation2 + $0x2a8] ss:$16 sps:$4 sm:$0xff]   ;;  %v4406_v33 = vld [vmem:[#allocation2 + $0x2cc] ss:$16 sps:$4 sm:$0xff]   ;;  %s4825_s29 = scalar_lea.vmem %s5504_s18, 512 }
  0x5a   : > { %v404_v27 = vld [vmem:[%s5074_s20 + $0x60] sm:$0xff]  ;;  %v4416_v46 = vld [vmem:[#allocation2 + $0x308] ss:$16 sps:$4 sm:$0xff]   ;;  %p4826_p6 = scmp.ne.s32.totalorder %s5504_s18, %s4825_s29  ;;  %p5624_p9 = scmp.ne.s32.totalorder %s5615_s23, 0 }
  0x5b   : > { %v3667_v28 = vcombine.high %v400_v26, %v404_v27  ;;  %v4395_v29 = vld [vmem:[#allocation2 + $0x2a0] ss:$16 sps:$4 sm:$0xff]   ;;  %v3666_v31 = vcombine.low %v400_v26, %v404_v27  ;;  %v4403_v32 = vld [vmem:[#allocation2 + $0x2c4] ss:$16 sps:$4 sm:$0xff]   ;;  %v4422_v50 = vld [vmem:[#allocation2 + $0x328] ss:$16 sps:$4 sm:$0xff]  }
  0x5c   : > { %2063 = vmatpush1.bf16.msra.mxu0 %v4321_v34  ;;  %2275 = vmatpush1.bf16.msra.mxu1 %v4322_v35  ;;  %v5081_v34 = vld [vmem:[%s5074_s20 + $0x8] sm:$0xff]  ;;  %v4421_v47 = vld [vmem:[#allocation2 + $0x324] ss:$16 sps:$4 sm:$0xff]   ;;  %p4827_p10 = pnand %p4826_p6, %p5624_p9  ;;  %s4928_s30 = smov [#allocation5]  }
  0x5d   : > { %2064 = vmatprep.subr.bf16.mxu0 %v4323_v36  ;;  %2276 = vmatprep.subr.bf16.mxu1 %v4325_v37  ;;  %v5084_v35 = vld [vmem:[%s5074_s20 + $0x28] sm:$0xff]  ;;  %v4401_v36 = vld [vmem:[#allocation2 + $0x2c0] ss:$16 sps:$4 sm:$0xff]  }
  0x5e   : > { %v4404_v37 = vld [vmem:[#allocation2 + $0x2c8] ss:$16 sps:$4 sm:$0xff]   ;;  %v5096_v27 = vld [vmem:[%s5074_s20 + $0x30] sm:$0xff]  ;;  %p4828_p12 = pneg %p4827_p10 }
  0x60   : > { %2065 = vmatpush1.bf16.msra.mxu0 %v4327_v38  ;;  %2277 = vmatpush1.bf16.msra.mxu1 %v4328_v39  ;;  %v3661_v38 = vcombine.high %v5081_v34, %v5084_v35  ;;  %v4409_v39 = vld [vmem:[#allocation2 + $0x2e4] ss:$16 sps:$4 sm:$0xff]  }
  0x61   : > { %2066 = vmatprep.subr.bf16.mxu0 %v4329_v40  ;;  %2278 = vmatprep.subr.bf16.mxu1 %v4331_v41  ;;  %v4412_v40 = vld [vmem:[#allocation2 + $0x2ec] ss:$16 sps:$4 sm:$0xff]   ;;  %v4407_v41 = vld [vmem:[#allocation2 + $0x2e0] ss:$16 sps:$4 sm:$0xff]  }
  0x64   : > { %2067 = vmatpush1.bf16.msra.mxu0 %v4333_v42  ;;  %2279 = vmatpush1.bf16.msra.mxu1 %v4334_v43  ;;  %v4410_v42 = vld [vmem:[#allocation2 + $0x2e8] ss:$16 sps:$4 sm:$0xff]   ;;  %v4415_v43 = vld [vmem:[#allocation2 + $0x304] ss:$16 sps:$4 sm:$0xff]  }
  0x65   : > { %2068 = vmatprep.subr.bf16.mxu0 %v4335_v44  ;;  %2280 = vmatprep.subr.bf16.mxu1 %v4337_v45  ;;  %v4418_v44 = vld [vmem:[#allocation2 + $0x30c] ss:$16 sps:$4 sm:$0xff]   ;;  %v4413_v45 = vld [vmem:[#allocation2 + $0x300] ss:$16 sps:$4 sm:$0xff]  }
  0x68   : > { %2069 = vmatpush1.bf16.msra.mxu0 %v4339_v48  ;;  %2281 = vmatpush1.bf16.msra.mxu1 %v4340_v49  ;;  %v4424_v48 = vld [vmem:[#allocation2 + $0x32c] ss:$16 sps:$4 sm:$0xff]   ;;  %v4419_v49 = vld [vmem:[#allocation2 + $0x320] ss:$16 sps:$4 sm:$0xff]  }
  0x69   : > { %2070 = vmatprep.subr.bf16.mxu0 %v4341_v51  ;;  %2282 = vmatprep.subr.bf16.mxu1 %v4343_v52  ;;  %v4427_v51 = vld [vmem:[#allocation2 + $0x344] ss:$16 sps:$4 sm:$0xff]   ;;  %v4430_v52 = vld [vmem:[#allocation2 + $0x34c] ss:$16 sps:$4 sm:$0xff]  }
  0x6c   : > { %2071 = vmatpush1.bf16.msra.mxu0 %v4345_v53  ;;  %2283 = vmatpush1.bf16.msra.mxu1 %v4346_v54  ;;  %v4425_v53 = vld [vmem:[#allocation2 + $0x340] ss:$16 sps:$4 sm:$0xff]   ;;  %v4428_v54 = vld [vmem:[#allocation2 + $0x348] ss:$16 sps:$4 sm:$0xff]  }
  0x6d   : > { %2072 = vmatprep.subr.bf16.mxu0 %v4347_v55  ;;  %2284 = vmatprep.subr.bf16.mxu1 %v4349_v56  ;;  %v4433_v55 = vld [vmem:[#allocation2 + $0x364] ss:$16 sps:$4 sm:$0xff]   ;;  %v4436_v56 = vld [vmem:[#allocation2 + $0x36c] ss:$16 sps:$4 sm:$0xff]  }
  0x70   : > { %2073 = vmatpush1.bf16.msra.mxu0 %v4351_v57  ;;  %2285 = vmatpush1.bf16.msra.mxu1 %v4352_v58  ;;  %v4431_v57 = vld [vmem:[#allocation2 + $0x360] ss:$16 sps:$4 sm:$0xff]   ;;  %v4434_v58 = vld [vmem:[#allocation2 + $0x368] ss:$16 sps:$4 sm:$0xff]  }
  0x71   : > { %2074 = vmatprep.subr.bf16.mxu0 %v4353_v59  ;;  %2286 = vmatprep.subr.bf16.mxu1 %v4355_v60  ;;  %v4439_v59 = vld [vmem:[#allocation2 + $0x384] ss:$16 sps:$4 sm:$0xff]   ;;  %v4442_v60 = vld [vmem:[#allocation2 + $0x38c] ss:$16 sps:$4 sm:$0xff]  }
  0x74   : > { %2075 = vmatpush1.bf16.msra.mxu0 %v4357_v61  ;;  %2287 = vmatpush1.bf16.msra.mxu1 %v4358_v62  ;;  %v4437_v61 = vld [vmem:[#allocation2 + $0x380] ss:$16 sps:$4 sm:$0xff]   ;;  %v4440_v62 = vld [vmem:[#allocation2 + $0x388] ss:$16 sps:$4 sm:$0xff]  }
  0x75   : > { %2076 = vmatprep.subr.bf16.mxu0 %v4359_v63  ;;  %2288 = vmatprep.subr.bf16.mxu1 %v4361_v0  ;;  %v4445_v63 = vld [vmem:[#allocation2 + $0x3a4] ss:$16 sps:$4 sm:$0xff]   ;;  %v4448_v0 = vld [vmem:[#allocation2 + $0x3ac] ss:$16 sps:$4 sm:$0xff]  }
  0x78   : > { %2077 = vmatpush1.bf16.msra.mxu0 %v4363_v1  ;;  %2289 = vmatpush1.bf16.msra.mxu1 %v4364_v2  ;;  %v4443_v1 = vld [vmem:[#allocation2 + $0x3a0] ss:$16 sps:$4 sm:$0xff]   ;;  %v4446_v2 = vld [vmem:[#allocation2 + $0x3a8] ss:$16 sps:$4 sm:$0xff]  }
  0x79   : > { %2099 = vmatprep.subr.bf16.mxu0 %v4367_v3  ;;  %2311 = vmatprep.subr.bf16.mxu1 %v4370_v4  ;;  %v4451_v3 = vld [vmem:[#allocation2 + $0x3c4] ss:$16 sps:$4 sm:$0xff]   ;;  %v4454_v4 = vld [vmem:[#allocation2 + $0x3cc] ss:$16 sps:$4 sm:$0xff]  }
  0x7b   : > { %2079 = vmatmul.mubr.bf16.vlgmr.msra.gmra.mrb[0].mxu0 %v3658_v5  ;;  %2291 = vmatmul.mubr.bf16.vlgmr.msra.gmra.mrb[0].mxu1 %v3658_v5  ;;  %v4449_v5 = vld [vmem:[#allocation2 + $0x3c0] ss:$16 sps:$4 sm:$0xff]  }
  0x7c   : > { %2100 = vmatpush1.bf16.msra.mxu0 %v4365_v6  ;;  %2312 = vmatpush1.bf16.msra.mxu1 %v4368_v7  ;;  %v4452_v6 = vld [vmem:[#allocation2 + $0x3c8] ss:$16 sps:$4 sm:$0xff]   ;;  %v4457_v7 = vld [vmem:[#allocation2 + $0x3e4] ss:$16 sps:$4 sm:$0xff]  }
  0x7d   : > { %2101 = vmatprep.subr.bf16.mxu0 %v4373_v8  ;;  %2313 = vmatprep.subr.bf16.mxu1 %v4376_v9  ;;  %v4460_v8 = vld [vmem:[#allocation2 + $0x3ec] ss:$16 sps:$4 sm:$0xff]   ;;  %v4455_v9 = vld [vmem:[#allocation2 + $0x3e0] ss:$16 sps:$4 sm:$0xff]  }
  0x7e   : > { %2088 = vmatprep.mubr.bf16.mxu0 %v3667_v28  ;;  %2300 = vmatprep.mubr.bf16.mxu1 %v3667_v28  ;;  %v4473_v28 = vld [vmem:[#allocation2 + $0x440] ss:$16 sps:$4 sm:$0xff]  }
  0x80   : > { %2102 = vmatpush1.bf16.msra.mxu0 %v4371_v10  ;;  %2314 = vmatpush1.bf16.msra.mxu1 %v4374_v11  ;;  %v4458_v10 = vld [vmem:[#allocation2 + $0x3e8] ss:$16 sps:$4 sm:$0xff]   ;;  %v4463_v11 = vld [vmem:[#allocation2 + $0x404] ss:$16 sps:$4 sm:$0xff]  }
  0x81   : > { %2103 = vmatprep.subr.bf16.mxu0 %v4379_v12  ;;  %2315 = vmatprep.subr.bf16.mxu1 %v4382_v13  ;;  %v4466_v12 = vld [vmem:[#allocation2 + $0x40c] ss:$16 sps:$4 sm:$0xff]   ;;  %v4461_v13 = vld [vmem:[#allocation2 + $0x400] ss:$16 sps:$4 sm:$0xff]  }
  0x83   : > { %2089 = vmatmul.mubr.bf16.gmra.mrb[4].mxu0 %v3666_v31  ;;  %2301 = vmatmul.mubr.bf16.gmra.mrb[4].mxu1 %v3666_v31  ;;  %v4484_v31 = vld [vmem:[#allocation2 + $0x46c] ss:$16 sps:$4 sm:$0xff]  }
  0x84   : > { %2104 = vmatpush1.bf16.msra.mxu0 %v4377_v14  ;;  %2316 = vmatpush1.bf16.msra.mxu1 %v4380_v15  ;;  %v4464_v14 = vld [vmem:[#allocation2 + $0x408] ss:$16 sps:$4 sm:$0xff]   ;;  %v3660_v15 = vcombine.low %v5081_v34, %v5084_v35  ;;  %v4487_v35 = vld [vmem:[#allocation2 + $0x484] ss:$16 sps:$4 sm:$0xff]  }
  0x85   : > { %2105 = vmatprep.subr.bf16.mxu0 %v4385_v16  ;;  %2317 = vmatprep.subr.bf16.mxu1 %v4388_v17  ;;  %v401_v16 = vld [vmem:[%s5074_s20 + $0x48] sm:$0xff] }
  0x86   : > { %2131 = vmatprep.mubr.bf16.mxu0 %v3661_v38  ;;  %2343 = vmatprep.mubr.bf16.mxu1 %v3661_v38  ;;  %v405_v17 = vld [vmem:[%s5074_s20 + $0x68] sm:$0xff] }
  0x87   : > { %v3668_v26 = vcombine.low %v401_v16, %v405_v17  ;;  %v4482_v34 = vld [vmem:[#allocation2 + $0x468] ss:$16 sps:$4 sm:$0xff]  }
  0x88   : > { %2106 = vmatpush1.bf16.msra.mxu0 %v4383_v18  ;;  %2318 = vmatpush1.bf16.msra.mxu1 %v4386_v19  ;;  %v4469_v18 = vld [vmem:[#allocation2 + $0x424] ss:$16 sps:$4 sm:$0xff]   ;;  %v4472_v19 = vld [vmem:[#allocation2 + $0x42c] ss:$16 sps:$4 sm:$0xff]   ;;  %v4488_v38 = vld [vmem:[#allocation2 + $0x488] ss:$16 sps:$4 sm:$0xff]  }
  0x89   : > { %2107 = vmatprep.subr.bf16.mxu0 %v4391_v20  ;;  %2319 = vmatprep.subr.bf16.mxu1 %v4394_v21  ;;  %v3669_v20 = vcombine.high %v401_v16, %v405_v17  ;;  %v4467_v21 = vld [vmem:[#allocation2 + $0x420] ss:$16 sps:$4 sm:$0xff]   ;;  %v4556_v16 = vld [vmem:[#allocation2 + $0x5ec] ss:$16 sps:$4 sm:$0xff]  }
  0x8a   : > { %v4551_v17 = vld [vmem:[#allocation2 + $0x5e0] ss:$16 sps:$4 sm:$0xff]  }
  0x8c   : > { %2108 = vmatpush1.bf16.msra.mxu0 %v4389_v22  ;;  %2320 = vmatpush1.bf16.msra.mxu1 %v4392_v23  ;;  %v4470_v22 = vld [vmem:[#allocation2 + $0x428] ss:$16 sps:$4 sm:$0xff]   ;;  %v4475_v23 = vld [vmem:[#allocation2 + $0x444] ss:$16 sps:$4 sm:$0xff]  }
  0x8d   : > { %2109 = vmatprep.subr.bf16.mxu0 %v4397_v24  ;;  %2321 = vmatprep.subr.bf16.mxu1 %v4400_v25  ;;  %v4478_v24 = vld [vmem:[#allocation2 + $0x44c] ss:$16 sps:$4 sm:$0xff]   ;;  %v5093_v25 = vld [vmem:[%s5074_s20 + $0x10] sm:$0xff] }
  0x90   : > { %2110 = vmatpush1.bf16.msra.mxu0 %v4395_v29  ;;  %2322 = vmatpush1.bf16.msra.mxu1 %v4398_v30  ;;  %v4476_v29 = vld [vmem:[#allocation2 + $0x448] ss:$16 sps:$4 sm:$0xff]   ;;  %v4481_v30 = vld [vmem:[#allocation2 + $0x464] ss:$16 sps:$4 sm:$0xff]  }
  0x91   : > { %2111 = vmatprep.subr.bf16.mxu0 %v4403_v32  ;;  %2323 = vmatprep.subr.bf16.mxu1 %v4406_v33  ;;  %v3663_v32 = vcombine.high %v5093_v25, %v5096_v27  ;;  %v4479_v33 = vld [vmem:[#allocation2 + $0x460] ss:$16 sps:$4 sm:$0xff]  }
  0x94   : > { %2112 = vmatpush1.bf16.msra.mxu0 %v4401_v36  ;;  %2324 = vmatpush1.bf16.msra.mxu1 %v4404_v37  ;;  %v4490_v36 = vld [vmem:[#allocation2 + $0x48c] ss:$16 sps:$4 sm:$0xff]   ;;  %v4485_v37 = vld [vmem:[#allocation2 + $0x480] ss:$16 sps:$4 sm:$0xff]  }
  0x95   : > { %2113 = vmatprep.subr.bf16.mxu0 %v4409_v39  ;;  %2325 = vmatprep.subr.bf16.mxu1 %v4412_v40  ;;  %v4493_v39 = vld [vmem:[#allocation2 + $0x4a4] ss:$16 sps:$4 sm:$0xff]   ;;  %v4496_v40 = vld [vmem:[#allocation2 + $0x4ac] ss:$16 sps:$4 sm:$0xff]  }
  0x98   : > { %2114 = vmatpush1.bf16.msra.mxu0 %v4407_v41  ;;  %2326 = vmatpush1.bf16.msra.mxu1 %v4410_v42  ;;  %v4491_v41 = vld [vmem:[#allocation2 + $0x4a0] ss:$16 sps:$4 sm:$0xff]   ;;  %v4494_v42 = vld [vmem:[#allocation2 + $0x4a8] ss:$16 sps:$4 sm:$0xff]  }
  0x99   : > { %2115 = vmatprep.subr.bf16.mxu0 %v4415_v43  ;;  %2327 = vmatprep.subr.bf16.mxu1 %v4418_v44  ;;  %v4499_v43 = vld [vmem:[#allocation2 + $0x4c4] ss:$16 sps:$4 sm:$0xff]   ;;  %v4502_v44 = vld [vmem:[#allocation2 + $0x4cc] ss:$16 sps:$4 sm:$0xff]  }
  0x9c   : > { %2116 = vmatpush1.bf16.msra.mxu0 %v4413_v45  ;;  %2328 = vmatpush1.bf16.msra.mxu1 %v4416_v46  ;;  %v4497_v45 = vld [vmem:[#allocation2 + $0x4c0] ss:$16 sps:$4 sm:$0xff]   ;;  %v4500_v46 = vld [vmem:[#allocation2 + $0x4c8] ss:$16 sps:$4 sm:$0xff]  }
  0x9d   : > { %2117 = vmatprep.subr.bf16.mxu0 %v4421_v47  ;;  %2329 = vmatprep.subr.bf16.mxu1 %v4424_v48  ;;  %v4505_v47 = vld [vmem:[#allocation2 + $0x4e4] ss:$16 sps:$4 sm:$0xff]   ;;  %v4508_v48 = vld [vmem:[#allocation2 + $0x4ec] ss:$16 sps:$4 sm:$0xff]  }
  0xa0   : > { %2118 = vmatpush1.bf16.msra.mxu0 %v4419_v49  ;;  %2330 = vmatpush1.bf16.msra.mxu1 %v4422_v50  ;;  %v4503_v49 = vld [vmem:[#allocation2 + $0x4e0] ss:$16 sps:$4 sm:$0xff]   ;;  %v4506_v50 = vld [vmem:[#allocation2 + $0x4e8] ss:$16 sps:$4 sm:$0xff]  }
  0xa1   : > { %2119 = vmatprep.subr.bf16.mxu0 %v4427_v51  ;;  %2331 = vmatprep.subr.bf16.mxu1 %v4430_v52  ;;  %v4511_v51 = vld [vmem:[#allocation2 + $0x504] ss:$16 sps:$4 sm:$0xff]   ;;  %v4514_v52 = vld [vmem:[#allocation2 + $0x50c] ss:$16 sps:$4 sm:$0xff]  }
  0xa4   : > { %2120 = vmatpush1.bf16.msra.mxu0 %v4425_v53  ;;  %2332 = vmatpush1.bf16.msra.mxu1 %v4428_v54  ;;  %v4509_v53 = vld [vmem:[#allocation2 + $0x500] ss:$16 sps:$4 sm:$0xff]   ;;  %v4512_v54 = vld [vmem:[#allocation2 + $0x508] ss:$16 sps:$4 sm:$0xff]  }
  0xa5   : > { %2121 = vmatprep.subr.bf16.mxu0 %v4433_v55  ;;  %2333 = vmatprep.subr.bf16.mxu1 %v4436_v56  ;;  %v4517_v55 = vld [vmem:[#allocation2 + $0x524] ss:$16 sps:$4 sm:$0xff]   ;;  %v4520_v56 = vld [vmem:[#allocation2 + $0x52c] ss:$16 sps:$4 sm:$0xff]  }
  0xa8   : > { %2122 = vmatpush1.bf16.msra.mxu0 %v4431_v57  ;;  %2334 = vmatpush1.bf16.msra.mxu1 %v4434_v58  ;;  %v4515_v57 = vld [vmem:[#allocation2 + $0x520] ss:$16 sps:$4 sm:$0xff]   ;;  %v4518_v58 = vld [vmem:[#allocation2 + $0x528] ss:$16 sps:$4 sm:$0xff]  }
  0xa9   : > { %2123 = vmatprep.subr.bf16.mxu0 %v4439_v59  ;;  %2335 = vmatprep.subr.bf16.mxu1 %v4442_v60  ;;  %v4523_v59 = vld [vmem:[#allocation2 + $0x544] ss:$16 sps:$4 sm:$0xff]   ;;  %v4526_v60 = vld [vmem:[#allocation2 + $0x54c] ss:$16 sps:$4 sm:$0xff]  }
  0xac   : > { %2124 = vmatpush1.bf16.msra.mxu0 %v4437_v61  ;;  %2336 = vmatpush1.bf16.msra.mxu1 %v4440_v62  ;;  %v4521_v61 = vld [vmem:[#allocation2 + $0x540] ss:$16 sps:$4 sm:$0xff]   ;;  %v4524_v62 = vld [vmem:[#allocation2 + $0x548] ss:$16 sps:$4 sm:$0xff]  }
  0xad   : > { %2125 = vmatprep.subr.bf16.mxu0 %v4445_v63  ;;  %2337 = vmatprep.subr.bf16.mxu1 %v4448_v0  ;;  %v4529_v63 = vld [vmem:[#allocation2 + $0x564] ss:$16 sps:$4 sm:$0xff]   ;;  %v4532_v0 = vld [vmem:[#allocation2 + $0x56c] ss:$16 sps:$4 sm:$0xff]  }
  0xb0   : > { %2126 = vmatpush1.bf16.msra.mxu0 %v4443_v1  ;;  %2338 = vmatpush1.bf16.msra.mxu1 %v4446_v2  ;;  %v4527_v1 = vld [vmem:[#allocation2 + $0x560] ss:$16 sps:$4 sm:$0xff]   ;;  %v4530_v2 = vld [vmem:[#allocation2 + $0x568] ss:$16 sps:$4 sm:$0xff]  }
  0xb1   : > { %2127 = vmatprep.subr.bf16.mxu0 %v4451_v3  ;;  %2339 = vmatprep.subr.bf16.mxu1 %v4454_v4  ;;  %v4535_v3 = vld [vmem:[#allocation2 + $0x584] ss:$16 sps:$4 sm:$0xff]   ;;  %v4538_v4 = vld [vmem:[#allocation2 + $0x58c] ss:$16 sps:$4 sm:$0xff]  }
  0xb4   : > { %2128 = vmatpush1.bf16.msra.mxu0 %v4449_v5  ;;  %2340 = vmatpush1.bf16.msra.mxu1 %v4452_v6  ;;  %v4533_v5 = vld [vmem:[#allocation2 + $0x580] ss:$16 sps:$4 sm:$0xff]   ;;  %v4536_v6 = vld [vmem:[#allocation2 + $0x588] ss:$16 sps:$4 sm:$0xff]  }
  0xb5   : > { %2129 = vmatprep.subr.bf16.mxu0 %v4457_v7  ;;  %2341 = vmatprep.subr.bf16.mxu1 %v4460_v8  ;;  %v4541_v7 = vld [vmem:[#allocation2 + $0x5a4] ss:$16 sps:$4 sm:$0xff]   ;;  %v4544_v8 = vld [vmem:[#allocation2 + $0x5ac] ss:$16 sps:$4 sm:$0xff]  }
  0xb8   : > { %2130 = vmatpush1.bf16.msra.mxu0 %v4455_v9  ;;  %2342 = vmatpush1.bf16.msra.mxu1 %v4458_v10  ;;  %v4539_v9 = vld [vmem:[#allocation2 + $0x5a0] ss:$16 sps:$4 sm:$0xff]   ;;  %v4542_v10 = vld [vmem:[#allocation2 + $0x5a8] ss:$16 sps:$4 sm:$0xff]  }
  0xb9   : > { %2152 = vmatprep.subr.bf16.mxu0 %v4463_v11  ;;  %2364 = vmatprep.subr.bf16.mxu1 %v4466_v12  ;;  %v4547_v11 = vld [vmem:[#allocation2 + $0x5c4] ss:$16 sps:$4 sm:$0xff]   ;;  %v4550_v12 = vld [vmem:[#allocation2 + $0x5cc] ss:$16 sps:$4 sm:$0xff]  }
  0xbb   : > { %2132 = vmatmul.mubr.bf16.vlgmr.msra.gmra.mrb[0].mxu0 %v3660_v15  ;;  %2344 = vmatmul.mubr.bf16.vlgmr.msra.gmra.mrb[0].mxu1 %v3660_v15  ;;  %v4553_v15 = vld [vmem:[#allocation2 + $0x5e4] ss:$16 sps:$4 sm:$0xff]  }
  0xbc   : > { %2153 = vmatpush1.bf16.msra.mxu0 %v4461_v13  ;;  %2365 = vmatpush1.bf16.msra.mxu1 %v4464_v14  ;;  %v4545_v13 = vld [vmem:[#allocation2 + $0x5c0] ss:$16 sps:$4 sm:$0xff]   ;;  %v4548_v14 = vld [vmem:[#allocation2 + $0x5c8] ss:$16 sps:$4 sm:$0xff]  }
  0xbd   : > { %2154 = vmatprep.subr.bf16.mxu0 %v4469_v18  ;;  %2366 = vmatprep.subr.bf16.mxu1 %v4472_v19  ;;  %v4554_v18 = vld [vmem:[#allocation2 + $0x5e8] ss:$16 sps:$4 sm:$0xff]   ;;  %v4559_v19 = vld [vmem:[#allocation2 + $0x604] ss:$16 sps:$4 sm:$0xff]  }
  0xbe   : > { %2141 = vmatprep.mubr.bf16.mxu0 %v3669_v20  ;;  %2353 = vmatprep.mubr.bf16.mxu1 %v3669_v20  ;;  %v4562_v20 = vld [vmem:[#allocation2 + $0x60c] ss:$16 sps:$4 sm:$0xff]  }
  0xc0   : > { %2155 = vmatpush1.bf16.msra.mxu0 %v4467_v21  ;;  %2367 = vmatpush1.bf16.msra.mxu1 %v4470_v22  ;;  %v4557_v21 = vld [vmem:[#allocation2 + $0x600] ss:$16 sps:$4 sm:$0xff]   ;;  %v4560_v22 = vld [vmem:[#allocation2 + $0x608] ss:$16 sps:$4 sm:$0xff]  }
  0xc1   : > { %2156 = vmatprep.subr.bf16.mxu0 %v4475_v23  ;;  %2368 = vmatprep.subr.bf16.mxu1 %v4478_v24  ;;  %v3662_v23 = vcombine.low %v5093_v25, %v5096_v27  ;;  %v402_v24 = vld [vmem:[%s5074_s20 + $0x50] sm:$0xff]  ;;  %v5105_v25 = vld [vmem:[%s5074_s20 + $0x18] sm:$0xff] }
  0xc2   : > { %v5108_v27 = vld [vmem:[%s5074_s20 + $0x38] sm:$0xff] }
  0xc3   : > { %2142 = vmatmul.mubr.bf16.gmra.mrb[4].mxu0 %v3668_v26  ;;  %2354 = vmatmul.mubr.bf16.gmra.mrb[4].mxu1 %v3668_v26  ;;  %v406_v26 = vld [vmem:[%s5074_s20 + $0x70] sm:$0xff] }
  0xc4   : > { %2157 = vmatpush1.bf16.msra.mxu0 %v4473_v28  ;;  %2369 = vmatpush1.bf16.msra.mxu1 %v4476_v29  ;;  %v4565_v28 = vld [vmem:[#allocation2 + $0x624] ss:$16 sps:$4 sm:$0xff]   ;;  %v4568_v29 = vld [vmem:[#allocation2 + $0x62c] ss:$16 sps:$4 sm:$0xff]  }
  0xc5   : > { %2158 = vmatprep.subr.bf16.mxu0 %v4481_v30  ;;  %2370 = vmatprep.subr.bf16.mxu1 %v4484_v31  ;;  %v4563_v30 = vld [vmem:[#allocation2 + $0x620] ss:$16 sps:$4 sm:$0xff]   ;;  %v4566_v31 = vld [vmem:[#allocation2 + $0x628] ss:$16 sps:$4 sm:$0xff]  }
  0xc6   : > { %2184 = vmatprep.mubr.bf16.mxu0 %v3663_v32  ;;  %2396 = vmatprep.mubr.bf16.mxu1 %v3663_v32  ;;  %v3671_v32 = vcombine.high %v402_v24, %v406_v26 }
  0xc8   : > { %2159 = vmatpush1.bf16.msra.mxu0 %v4479_v33  ;;  %2371 = vmatpush1.bf16.msra.mxu1 %v4482_v34  ;;  %v4571_v33 = vld [vmem:[#allocation2 + $0x644] ss:$16 sps:$4 sm:$0xff]   ;;  %v4574_v34 = vld [vmem:[#allocation2 + $0x64c] ss:$16 sps:$4 sm:$0xff]  }
  0xc9   : > { %2160 = vmatprep.subr.bf16.mxu0 %v4487_v35  ;;  %2372 = vmatprep.subr.bf16.mxu1 %v4490_v36  ;;  %v4569_v35 = vld [vmem:[#allocation2 + $0x640] ss:$16 sps:$4 sm:$0xff]   ;;  %v4572_v36 = vld [vmem:[#allocation2 + $0x648] ss:$16 sps:$4 sm:$0xff]  }
  0xcc   : > { %2161 = vmatpush1.bf16.msra.mxu0 %v4485_v37  ;;  %2373 = vmatpush1.bf16.msra.mxu1 %v4488_v38  ;;  %v4577_v37 = vld [vmem:[#allocation2 + $0x664] ss:$16 sps:$4 sm:$0xff]   ;;  %v4580_v38 = vld [vmem:[#allocation2 + $0x66c] ss:$16 sps:$4 sm:$0xff]  }
  0xcd   : > { %2162 = vmatprep.subr.bf16.mxu0 %v4493_v39  ;;  %2374 = vmatprep.subr.bf16.mxu1 %v4496_v40  ;;  %v3670_v39 = vcombine.low %v402_v24, %v406_v26  ;;  %v4575_v40 = vld [vmem:[#allocation2 + $0x660] ss:$16 sps:$4 sm:$0xff]   ;;  %v4652_v24 = vld [vmem:[#allocation2 + $0x7ec] ss:$16 sps:$4 sm:$0xff]  }
  0xce   : > { %v4647_v26 = vld [vmem:[#allocation2 + $0x7e0] ss:$16 sps:$4 sm:$0xff]  }
  0xd0   : > { %2163 = vmatpush1.bf16.msra.mxu0 %v4491_v41  ;;  %2375 = vmatpush1.bf16.msra.mxu1 %v4494_v42  ;;  %v4578_v41 = vld [vmem:[#allocation2 + $0x668] ss:$16 sps:$4 sm:$0xff]   ;;  %v3665_v42 = vcombine.high %v5105_v25, %v5108_v27 }
  0xd1   : > { %2164 = vmatprep.subr.bf16.mxu0 %v4499_v43  ;;  %2376 = vmatprep.subr.bf16.mxu1 %v4502_v44  ;;  %v4583_v43 = vld [vmem:[#allocation2 + $0x684] ss:$16 sps:$4 sm:$0xff]   ;;  %v4586_v44 = vld [vmem:[#allocation2 + $0x68c] ss:$16 sps:$4 sm:$0xff]  }
  0xd4   : > { %2165 = vmatpush1.bf16.msra.mxu0 %v4497_v45  ;;  %2377 = vmatpush1.bf16.msra.mxu1 %v4500_v46  ;;  %v4581_v45 = vld [vmem:[#allocation2 + $0x680] ss:$16 sps:$4 sm:$0xff]   ;;  %v4584_v46 = vld [vmem:[#allocation2 + $0x688] ss:$16 sps:$4 sm:$0xff]  }
  0xd5   : > { %2166 = vmatprep.subr.bf16.mxu0 %v4505_v47  ;;  %2378 = vmatprep.subr.bf16.mxu1 %v4508_v48  ;;  %v4589_v47 = vld [vmem:[#allocation2 + $0x6a4] ss:$16 sps:$4 sm:$0xff]   ;;  %v4592_v48 = vld [vmem:[#allocation2 + $0x6ac] ss:$16 sps:$4 sm:$0xff]  }
  0xd8   : > { %2167 = vmatpush1.bf16.msra.mxu0 %v4503_v49  ;;  %2379 = vmatpush1.bf16.msra.mxu1 %v4506_v50  ;;  %v4587_v49 = vld [vmem:[#allocation2 + $0x6a0] ss:$16 sps:$4 sm:$0xff]   ;;  %v4590_v50 = vld [vmem:[#allocation2 + $0x6a8] ss:$16 sps:$4 sm:$0xff]  }
  0xd9   : > { %2168 = vmatprep.subr.bf16.mxu0 %v4511_v51  ;;  %2380 = vmatprep.subr.bf16.mxu1 %v4514_v52  ;;  %v4595_v51 = vld [vmem:[#allocation2 + $0x6c4] ss:$16 sps:$4 sm:$0xff]   ;;  %v4598_v52 = vld [vmem:[#allocation2 + $0x6cc] ss:$16 sps:$4 sm:$0xff]  }
  0xdc   : > { %2169 = vmatpush1.bf16.msra.mxu0 %v4509_v53  ;;  %2381 = vmatpush1.bf16.msra.mxu1 %v4512_v54  ;;  %v4593_v53 = vld [vmem:[#allocation2 + $0x6c0] ss:$16 sps:$4 sm:$0xff]   ;;  %v4596_v54 = vld [vmem:[#allocation2 + $0x6c8] ss:$16 sps:$4 sm:$0xff]  }
  0xdd   : > { %2170 = vmatprep.subr.bf16.mxu0 %v4517_v55  ;;  %2382 = vmatprep.subr.bf16.mxu1 %v4520_v56  ;;  %v4601_v55 = vld [vmem:[#allocation2 + $0x6e4] ss:$16 sps:$4 sm:$0xff]   ;;  %v4604_v56 = vld [vmem:[#allocation2 + $0x6ec] ss:$16 sps:$4 sm:$0xff]  }
  0xe0   : > { %2171 = vmatpush1.bf16.msra.mxu0 %v4515_v57  ;;  %2383 = vmatpush1.bf16.msra.mxu1 %v4518_v58  ;;  %v4599_v57 = vld [vmem:[#allocation2 + $0x6e0] ss:$16 sps:$4 sm:$0xff]   ;;  %v4602_v58 = vld [vmem:[#allocation2 + $0x6e8] ss:$16 sps:$4 sm:$0xff]  }
  0xe1   : > { %2172 = vmatprep.subr.bf16.mxu0 %v4523_v59  ;;  %2384 = vmatprep.subr.bf16.mxu1 %v4526_v60  ;;  %v4607_v59 = vld [vmem:[#allocation2 + $0x704] ss:$16 sps:$4 sm:$0xff]   ;;  %v4610_v60 = vld [vmem:[#allocation2 + $0x70c] ss:$16 sps:$4 sm:$0xff]  }
  0xe4   : > { %2173 = vmatpush1.bf16.msra.mxu0 %v4521_v61  ;;  %2385 = vmatpush1.bf16.msra.mxu1 %v4524_v62  ;;  %v4605_v61 = vld [vmem:[#allocation2 + $0x700] ss:$16 sps:$4 sm:$0xff]   ;;  %v4608_v62 = vld [vmem:[#allocation2 + $0x708] ss:$16 sps:$4 sm:$0xff]  }
  0xe5   : > { %2174 = vmatprep.subr.bf16.mxu0 %v4529_v63  ;;  %2386 = vmatprep.subr.bf16.mxu1 %v4532_v0  ;;  %v4613_v63 = vld [vmem:[#allocation2 + $0x724] ss:$16 sps:$4 sm:$0xff]   ;;  %v4616_v0 = vld [vmem:[#allocation2 + $0x72c] ss:$16 sps:$4 sm:$0xff]  }
  0xe8   : > { %2175 = vmatpush1.bf16.msra.mxu0 %v4527_v1  ;;  %2387 = vmatpush1.bf16.msra.mxu1 %v4530_v2  ;;  %v4611_v1 = vld [vmem:[#allocation2 + $0x720] ss:$16 sps:$4 sm:$0xff]   ;;  %v4614_v2 = vld [vmem:[#allocation2 + $0x728] ss:$16 sps:$4 sm:$0xff]  }
  0xe9   : > { %2176 = vmatprep.subr.bf16.mxu0 %v4535_v3  ;;  %2388 = vmatprep.subr.bf16.mxu1 %v4538_v4  ;;  %v4619_v3 = vld [vmem:[#allocation2 + $0x744] ss:$16 sps:$4 sm:$0xff]   ;;  %v4622_v4 = vld [vmem:[#allocation2 + $0x74c] ss:$16 sps:$4 sm:$0xff]  }
  0xec   : > { %2177 = vmatpush1.bf16.msra.mxu0 %v4533_v5  ;;  %2389 = vmatpush1.bf16.msra.mxu1 %v4536_v6  ;;  %v4617_v5 = vld [vmem:[#allocation2 + $0x740] ss:$16 sps:$4 sm:$0xff]   ;;  %v4620_v6 = vld [vmem:[#allocation2 + $0x748] ss:$16 sps:$4 sm:$0xff]  }
  0xed   : > { %2178 = vmatprep.subr.bf16.mxu0 %v4541_v7  ;;  %2390 = vmatprep.subr.bf16.mxu1 %v4544_v8  ;;  %v4625_v7 = vld [vmem:[#allocation2 + $0x764] ss:$16 sps:$4 sm:$0xff]   ;;  %v4628_v8 = vld [vmem:[#allocation2 + $0x76c] ss:$16 sps:$4 sm:$0xff]  }
  0xf0   : > { %2179 = vmatpush1.bf16.msra.mxu0 %v4539_v9  ;;  %2391 = vmatpush1.bf16.msra.mxu1 %v4542_v10  ;;  %v4623_v9 = vld [vmem:[#allocation2 + $0x760] ss:$16 sps:$4 sm:$0xff]   ;;  %v4626_v10 = vld [vmem:[#allocation2 + $0x768] ss:$16 sps:$4 sm:$0xff]  }
  0xf1   : > { %2180 = vmatprep.subr.bf16.mxu0 %v4547_v11  ;;  %2392 = vmatprep.subr.bf16.mxu1 %v4550_v12  ;;  %v4631_v11 = vld [vmem:[#allocation2 + $0x784] ss:$16 sps:$4 sm:$0xff]   ;;  %v4634_v12 = vld [vmem:[#allocation2 + $0x78c] ss:$16 sps:$4 sm:$0xff]  }
  0xf4   : > { %2181 = vmatpush1.bf16.msra.mxu0 %v4545_v13  ;;  %2393 = vmatpush1.bf16.msra.mxu1 %v4548_v14  ;;  %v4629_v13 = vld [vmem:[#allocation2 + $0x780] ss:$16 sps:$4 sm:$0xff]   ;;  %v4632_v14 = vld [vmem:[#allocation2 + $0x788] ss:$16 sps:$4 sm:$0xff]  }
  0xf5   : > { %2182 = vmatprep.subr.bf16.mxu0 %v4553_v15  ;;  %2394 = vmatprep.subr.bf16.mxu1 %v4556_v16  ;;  %v4637_v15 = vld [vmem:[#allocation2 + $0x7a4] ss:$16 sps:$4 sm:$0xff]   ;;  %v4640_v16 = vld [vmem:[#allocation2 + $0x7ac] ss:$16 sps:$4 sm:$0xff]  }
  0xf8   : > { %2183 = vmatpush1.bf16.msra.mxu0 %v4551_v17  ;;  %2395 = vmatpush1.bf16.msra.mxu1 %v4554_v18  ;;  %v4635_v17 = vld [vmem:[#allocation2 + $0x7a0] ss:$16 sps:$4 sm:$0xff]   ;;  %v4638_v18 = vld [vmem:[#allocation2 + $0x7a8] ss:$16 sps:$4 sm:$0xff]  }
  0xf9   : > { %2205 = vmatprep.subr.bf16.mxu0 %v4559_v19  ;;  %2417 = vmatprep.subr.bf16.mxu1 %v4562_v20  ;;  %v4643_v19 = vld [vmem:[#allocation2 + $0x7c4] ss:$16 sps:$4 sm:$0xff]   ;;  %v4646_v20 = vld [vmem:[#allocation2 + $0x7cc] ss:$16 sps:$4 sm:$0xff]  }
  0xfb   : > { %2185 = vmatmul.mubr.bf16.vlgmr.msra.gmra.mrb[0].mxu0 %v3662_v23  ;;  %2397 = vmatmul.mubr.bf16.vlgmr.msra.gmra.mrb[0].mxu1 %v3662_v23  ;;  %v4649_v23 = vld [vmem:[#allocation2 + $0x7e4] ss:$16 sps:$4 sm:$0xff]  }
  0xfc   : > { %2206 = vmatpush1.bf16.msra.mxu0 %v4557_v21  ;;  %2418 = vmatpush1.bf16.msra.mxu1 %v4560_v22  ;;  %v4641_v21 = vld [vmem:[#allocation2 + $0x7c0] ss:$16 sps:$4 sm:$0xff]   ;;  %v4644_v22 = vld [vmem:[#allocation2 + $0x7c8] ss:$16 sps:$4 sm:$0xff]  }
  0xfd   : > { %2207 = vmatprep.subr.bf16.mxu0 %v4565_v28  ;;  %2419 = vmatprep.subr.bf16.mxu1 %v4568_v29  ;;  %v4650_v28 = vld [vmem:[#allocation2 + $0x7e8] ss:$16 sps:$4 sm:$0xff]  }
  0xfe   : > { %2194 = vmatprep.mubr.bf16.mxu0 %v3671_v32  ;;  %2406 = vmatprep.mubr.bf16.mxu1 %v3671_v32  ;;  %v403_v29 = vld [vmem:[%s5074_s20 + $0x58] sm:$0xff]  ;;  %v3664_v32 = vcombine.low %v5105_v25, %v5108_v27  ;;  %v4661_v27 = vld [vmem:[%s5599_s3 + $0x24] ss:$8 sps:$4 sm:$0xff]  }
  0xff   : > { %v4656_v25 = vld [vmem:[%s5599_s3 + $0x10] ss:$8 sps:$4 sm:$0xff]  }
 0x100   : > { %2208 = vmatpush1.bf16.msra.mxu0 %v4563_v30  ;;  %2420 = vmatpush1.bf16.msra.mxu1 %v4566_v31  ;;  %v407_v30 = vld [vmem:[%s5074_s20 + $0x78] sm:$0xff]  ;;  %v4655_v31 = vld [vmem:[%s5599_s3 + $0x4] ss:$8 sps:$4 sm:$0xff]   ;;  %s5512_s20 = scalar_lea.hbm %s5605_s9, %s5611_s25 }
 0x101   : > { %2209 = vmatprep.subr.bf16.mxu0 %v4571_v33  ;;  %2421 = vmatprep.subr.bf16.mxu1 %v4574_v34  ;;  %v3673_v33 = vcombine.high %v403_v29, %v407_v30  ;;  %v4653_v34 = vld [vmem:[%s5599_s3] ss:$8 sps:$4 sm:$0xff]  }
 0x103   : > { %2195 = vmatmul.mubr.bf16.gmra.mrb[4].mxu0 %v3670_v39  ;;  %2407 = vmatmul.mubr.bf16.gmra.mrb[4].mxu1 %v3670_v39  ;;  %v4662_v39 = vld [vmem:[%s5599_s3 + $0x30] ss:$8 sps:$4 sm:$0xff]  }
 0x104   : > { %2210 = vmatpush1.bf16.msra.mxu0 %v4569_v35  ;;  %2422 = vmatpush1.bf16.msra.mxu1 %v4572_v36  ;;  %v4658_v35 = vld [vmem:[%s5599_s3 + $0x14] ss:$8 sps:$4 sm:$0xff]   ;;  %v3672_v36 = vcombine.low %v403_v29, %v407_v30 }
 0x105   : > { %2211 = vmatprep.subr.bf16.mxu0 %v4577_v37  ;;  %2423 = vmatprep.subr.bf16.mxu1 %v4580_v38  ;;  %v4659_v37 = vld [vmem:[%s5599_s3 + $0x20] ss:$8 sps:$4 sm:$0xff]   ;;  %v4664_v38 = vld [vmem:[%s5599_s3 + $0x34] ss:$8 sps:$4 sm:$0xff]  }
 0x106   : > { %2237 = vmatprep.mubr.bf16.mxu0 %v3665_v42  ;;  %2449 = vmatprep.mubr.bf16.mxu1 %v3665_v42  ;;  %v4670_v42 = vld [vmem:[%s5599_s3 + $0x54] ss:$8 sps:$4 sm:$0xff]  }
 0x108   : > { %2212 = vmatpush1.bf16.msra.mxu0 %v4575_v40  ;;  %2424 = vmatpush1.bf16.msra.mxu1 %v4578_v41  ;;  %v4667_v40 = vld [vmem:[%s5599_s3 + $0x44] ss:$8 sps:$4 sm:$0xff]   ;;  %v4665_v41 = vld [vmem:[%s5599_s3 + $0x40] ss:$8 sps:$4 sm:$0xff]  }
 0x109   : > { %2213 = vmatprep.subr.bf16.mxu0 %v4583_v43  ;;  %2425 = vmatprep.subr.bf16.mxu1 %v4586_v44  ;;  %v4668_v43 = vld [vmem:[%s5599_s3 + $0x50] ss:$8 sps:$4 sm:$0xff]   ;;  %v4673_v44 = vld [vmem:[%s5599_s3 + $0x64] ss:$8 sps:$4 sm:$0xff]  }
 0x10c   : > { %2214 = vmatpush1.bf16.msra.mxu0 %v4581_v45  ;;  %2426 = vmatpush1.bf16.msra.mxu1 %v4584_v46  ;;  %v4671_v45 = vld [vmem:[%s5599_s3 + $0x60] ss:$8 sps:$4 sm:$0xff]   ;;  %v4676_v46 = vld [vmem:[%s5599_s3 + $0x74] ss:$8 sps:$4 sm:$0xff]  }
 0x10d   : > { %2215 = vmatprep.subr.bf16.mxu0 %v4589_v47  ;;  %2427 = vmatprep.subr.bf16.mxu1 %v4592_v48  ;;  %v4674_v47 = vld [vmem:[%s5599_s3 + $0x70] ss:$8 sps:$4 sm:$0xff]   ;;  %v4679_v48 = vld [vmem:[%s5599_s3 + $0x84] ss:$8 sps:$4 sm:$0xff]  }
 0x110   : > { %2216 = vmatpush1.bf16.msra.mxu0 %v4587_v49  ;;  %2428 = vmatpush1.bf16.msra.mxu1 %v4590_v50  ;;  %v4677_v49 = vld [vmem:[%s5599_s3 + $0x80] ss:$8 sps:$4 sm:$0xff]   ;;  %v4682_v50 = vld [vmem:[%s5599_s3 + $0x94] ss:$8 sps:$4 sm:$0xff]  }
 0x111   : > { %2217 = vmatprep.subr.bf16.mxu0 %v4595_v51  ;;  %2429 = vmatprep.subr.bf16.mxu1 %v4598_v52  ;;  %v4680_v51 = vld [vmem:[%s5599_s3 + $0x90] ss:$8 sps:$4 sm:$0xff]   ;;  %v4685_v52 = vld [vmem:[%s5599_s3 + $0xa4] ss:$8 sps:$4 sm:$0xff]  }
 0x114   : > { %2218 = vmatpush1.bf16.msra.mxu0 %v4593_v53  ;;  %2430 = vmatpush1.bf16.msra.mxu1 %v4596_v54  ;;  %v4683_v53 = vld [vmem:[%s5599_s3 + $0xa0] ss:$8 sps:$4 sm:$0xff]   ;;  %v4688_v54 = vld [vmem:[%s5599_s3 + $0xb4] ss:$8 sps:$4 sm:$0xff]  }
 0x115   : > { %2219 = vmatprep.subr.bf16.mxu0 %v4601_v55  ;;  %2431 = vmatprep.subr.bf16.mxu1 %v4604_v56  ;;  %v4686_v55 = vld [vmem:[%s5599_s3 + $0xb0] ss:$8 sps:$4 sm:$0xff]   ;;  %v4691_v56 = vld [vmem:[%s5599_s3 + $0xc4] ss:$8 sps:$4 sm:$0xff]  }
 0x118   : > { %2220 = vmatpush1.bf16.msra.mxu0 %v4599_v57  ;;  %2432 = vmatpush1.bf16.msra.mxu1 %v4602_v58  ;;  %v4689_v57 = vld [vmem:[%s5599_s3 + $0xc0] ss:$8 sps:$4 sm:$0xff]   ;;  %v4694_v58 = vld [vmem:[%s5599_s3 + $0xd4] ss:$8 sps:$4 sm:$0xff]  }
 0x119   : > { %2221 = vmatprep.subr.bf16.mxu0 %v4607_v59  ;;  %2433 = vmatprep.subr.bf16.mxu1 %v4610_v60  ;;  %v4692_v59 = vld [vmem:[%s5599_s3 + $0xd0] ss:$8 sps:$4 sm:$0xff]   ;;  %v4697_v60 = vld [vmem:[%s5599_s3 + $0xe4] ss:$8 sps:$4 sm:$0xff]  }
 0x11c   : > { %2222 = vmatpush1.bf16.msra.mxu0 %v4605_v61  ;;  %2434 = vmatpush1.bf16.msra.mxu1 %v4608_v62  ;;  %v4695_v61 = vld [vmem:[%s5599_s3 + $0xe0] ss:$8 sps:$4 sm:$0xff]   ;;  %v4700_v62 = vld [vmem:[%s5599_s3 + $0xf4] ss:$8 sps:$4 sm:$0xff]  }
 0x11d   : > { %2223 = vmatprep.subr.bf16.mxu0 %v4613_v63  ;;  %2435 = vmatprep.subr.bf16.mxu1 %v4616_v0  ;;  %v4698_v63 = vld [vmem:[%s5599_s3 + $0xf0] ss:$8 sps:$4 sm:$0xff]   ;;  %v4703_v0 = vld [vmem:[%s5599_s3 + $0x104] ss:$8 sps:$4 sm:$0xff]  }
 0x120   : > { %2224 = vmatpush1.bf16.msra.mxu0 %v4611_v1  ;;  %2436 = vmatpush1.bf16.msra.mxu1 %v4614_v2  ;;  %v4749_v1 = vld [vmem:[%s5601_s5 + $0x40] sm:$0xff]  }
 0x121   : > { %2225 = vmatprep.subr.bf16.mxu0 %v4619_v3  ;;  %2437 = vmatprep.subr.bf16.mxu1 %v4622_v4  ;;  %v4750_v2 = vld [vmem:[%s5601_s5] sm:$0xff]   ;;  %v4751_v3 = vld [vmem:[%s5601_s5 + $0x48] sm:$0xff]  }
 0x122   : > { %v4752_v4 = vld [vmem:[%s5601_s5 + $0x8] sm:$0xff]  }
 0x124   : > { %2226 = vmatpush1.bf16.msra.mxu0 %v4617_v5  ;;  %2438 = vmatpush1.bf16.msra.mxu1 %v4620_v6  ;;  %v4753_v5 = vld [vmem:[%s5601_s5 + $0x50] sm:$0xff]  }
 0x125   : > { %2227 = vmatprep.subr.bf16.mxu0 %v4625_v7  ;;  %2439 = vmatprep.subr.bf16.mxu1 %v4628_v8  ;;  %v4754_v6 = vld [vmem:[%s5601_s5 + $0x10] sm:$0xff]   ;;  %v4755_v7 = vld [vmem:[%s5601_s5 + $0x58] sm:$0xff]  }
 0x126   : > { %v4756_v8 = vld [vmem:[%s5601_s5 + $0x18] sm:$0xff]  }
 0x128   : > { %2228 = vmatpush1.bf16.msra.mxu0 %v4623_v9  ;;  %2440 = vmatpush1.bf16.msra.mxu1 %v4626_v10  ;;  %v4757_v9 = vld [vmem:[%s5601_s5 + $0x60] sm:$0xff]  }
 0x129   : > { %2229 = vmatprep.subr.bf16.mxu0 %v4631_v11  ;;  %2441 = vmatprep.subr.bf16.mxu1 %v4634_v12  ;;  %v4758_v10 = vld [vmem:[%s5601_s5 + $0x20] sm:$0xff]   ;;  %v666_v11 = vlaneseq }
 0x12b   : > { %v5245_v12 = vshrl.u32 %v666_v11, 7 }
 0x12c   : > { %2230 = vmatpush1.bf16.msra.mxu0 %v4629_v13  ;;  %2442 = vmatpush1.bf16.msra.mxu1 %v4632_v14 }
 0x12d   : > { %2231 = vmatprep.subr.bf16.mxu0 %v4637_v15  ;;  %2443 = vmatprep.subr.bf16.mxu1 %v4640_v16  ;;  %v668_v13 = vsub.s32 0, %v5245_v12  ;;  %v676_v14 = vsub.s32 2, %v5245_v12  ;;  %v664_v15 = vld [vmem:[%s5598_s2] sm:$0xf]  ;;  %v672_v16 = vsub.s32 1, %v5245_v12 }
 0x130   : > { %2232 = vmatpush1.bf16.msra.mxu0 %v4635_v17  ;;  %2444 = vmatpush1.bf16.msra.mxu1 %v4638_v18  ;;  %v680_v17 = vsub.s32 3, %v5245_v12  ;;  %v5256_v18 = vrot.slane %v664_v15, %v668_v13 }
 0x131   : > { %2233 = vmatprep.subr.bf16.mxu0 %v4643_v19  ;;  %2445 = vmatprep.subr.bf16.mxu1 %v4646_v20  ;;  %v5258_v19 = vrot.slane %v664_v15, %v676_v14  ;;  %v5262_v20 = vrot.slane %v664_v15, %v672_v16 }
 0x134   : > { %2234 = vmatpush1.bf16.msra.mxu0 %v4641_v21  ;;  %2446 = vmatpush1.bf16.msra.mxu1 %v4644_v22  ;;  %v5264_v21 = vrot.slane %v664_v15, %v680_v17 }
 0x135   : > { %2235 = vmatprep.subr.bf16.mxu0 %v4649_v23  ;;  %2447 = vmatprep.subr.bf16.mxu1 %v4652_v24 }
 0x138   : > { %2236 = vmatpush1.bf16.msra.mxu0 %v4647_v26  ;;  %2448 = vmatpush1.bf16.msra.mxu1 %v4650_v28 }
 0x139   : > { %2922 = vmatprep.subr.bf16.mxu0 %v4655_v31  ;;  %4042 = vmatprep.subr.bf16.mxu1 %v4749_v1 }
 0x13b   : > { %2238 = vmatmul.mubr.bf16.vlgmr.msra.gmra.mrb[0].mxu0 %v3664_v32  ;;  %2450 = vmatmul.mubr.bf16.vlgmr.msra.gmra.mrb[0].mxu1 %v3664_v32 }
 0x13c   : > { %2247 = vmatprep.mubr.bf16.mxu0 %v3673_v33  ;;  %2459 = vmatprep.mubr.bf16.mxu1 %v3673_v33 }
 0x13d   : > { %2923 = vmatpush1.bf16.msra.mxu0 %v4653_v34  ;;  %4043 = vmatpush3.bf16.msra.mxu1 %v4750_v2 }
 0x13e   : > { %2924 = vmatprep.subr.bf16.mxu0 %v4658_v35  ;;  %4044 = vmatprep.subr.bf16.mxu1 %v4751_v3 }
 0x141   : > { %2925 = vmatpush1.bf16.msra.mxu0 %v4656_v25  ;;  %4045 = vmatpush3.bf16.msra.mxu1 %v4752_v4 }
 0x142   : > { %2926 = vmatprep.subr.bf16.mxu0 %v4661_v27  ;;  %4046 = vmatprep.subr.bf16.mxu1 %v4753_v5 }
 0x143   : > { %2248 = vmatmul.mubr.bf16.gmra.mrb[4].mxu0 %v3672_v36  ;;  %2460 = vmatmul.mubr.bf16.gmra.mrb[4].mxu1 %v3672_v36 }
 0x145   : > { %2927 = vmatpush1.bf16.msra.mxu0 %v4659_v37  ;;  %4047 = vmatpush3.bf16.msra.mxu1 %v4754_v6 }
 0x146   : > { %2928 = vmatprep.subr.bf16.mxu0 %v4664_v38  ;;  %4048 = vmatprep.subr.bf16.mxu1 %v4755_v7 }
 0x149   : > { %2929 = vmatpush1.bf16.msra.mxu0 %v4662_v39  ;;  %4049 = vmatpush3.bf16.msra.mxu1 %v4756_v8 }
 0x14a   : > { %2930 = vmatprep.subr.bf16.mxu0 %v4667_v40  ;;  %4050 = vmatprep.subr.bf16.mxu1 %v4757_v9 }
 0x14d   : > { %2931 = vmatpush1.bf16.msra.mxu0 %v4665_v41  ;;  %4051 = vmatpush3.bf16.msra.mxu1 %v4758_v10 }
 0x14e   : > { %2932 = vmatprep.subr.bf16.mxu0 %v4670_v42 }
 0x151   : > { %2933 = vmatpush1.bf16.msra.mxu0 %v4668_v43 }
 0x152   : > { %2934 = vmatprep.subr.bf16.mxu0 %v4673_v44 }
 0x155   : > { %2935 = vmatpush1.bf16.msra.mxu0 %v4671_v45 }
 0x156   : > { %2936 = vmatprep.subr.bf16.mxu0 %v4676_v46 }
 0x159   : > { %2937 = vmatpush1.bf16.msra.mxu0 %v4674_v47 }
 0x15a   : > { %2938 = vmatprep.subr.bf16.mxu0 %v4679_v48 }
 0x15d   : > { %2939 = vmatpush1.bf16.msra.mxu0 %v4677_v49 }
 0x15e   : > { %2940 = vmatprep.subr.bf16.mxu0 %v4682_v50 }
 0x161   : > { %2941 = vmatpush1.bf16.msra.mxu0 %v4680_v51 }
 0x162   : > { %2942 = vmatprep.subr.bf16.mxu0 %v4685_v52 }
 0x165   : > { %2943 = vmatpush1.bf16.msra.mxu0 %v4683_v53 }
 0x166   : > { %2944 = vmatprep.subr.bf16.mxu0 %v4688_v54 }
 0x169   : > { %2945 = vmatpush1.bf16.msra.mxu0 %v4686_v55 }
 0x16a   : > { %2946 = vmatprep.subr.bf16.mxu0 %v4691_v56 }
 0x16d   : > { %2947 = vmatpush1.bf16.msra.mxu0 %v4689_v57 }
 0x16e   : > { %2948 = vmatprep.subr.bf16.mxu0 %v4694_v58 }
 0x171   : > { %2949 = vmatpush1.bf16.msra.mxu0 %v4692_v59 }
 0x172   : > { %2950 = vmatprep.subr.bf16.mxu0 %v4697_v60 }
 0x175   : > { %2951 = vmatpush1.bf16.msra.mxu0 %v4695_v61 }
 0x176   : > { %2952 = vmatprep.subr.bf16.mxu0 %v4700_v62 }
 0x179   : > { %2953 = vmatpush1.bf16.msra.mxu0 %v4698_v63 }
 0x17a   : > { %2975 = vmatprep.subr.bf16.mxu0 %v4703_v0 }
 0x20e   : > { %v2239_v22 = vpop.f32.mrb[0].mxu0  ;;  %v2451_v23 = vpop.f32.mrb[0].mxu1 }
 0x20f   : > { %v4130_v24 = vadd.f32 %v2239_v22, %v5256_v18  ;;  %v4138_v26 = vadd.f32 %v2451_v23, %v5258_v19  ;;  %v2241_v28 = vpop.f32.mrb[1].mxu0  ;;  %v2453_v29 = vpop.f32.mrb[1].mxu1 }
 0x210   : > { %v4131_v30 = vadd.f32 %v2241_v28, %v5262_v20  ;;  %v4139_v31 = vadd.f32 %v2453_v29, %v5264_v21  ;;  %v2243_v32 = vpop.f32.mrb[2].mxu0  ;;  %v2455_v33 = vpop.f32.mrb[2].mxu1 }
 0x211   : > { %vm2470_vm0 = vcmp.gt.f32.partialorder %v4130_v24, 0.0  ;;  %v2486_v34 = vmul.f32 0.5, %v4130_v24  ;;  %vm2472_vm1 = vcmp.gt.f32.partialorder %v4138_v26, 0.0  ;;  %v2488_v35 = vmul.f32 0.5, %v4138_v26  ;;  %v2245_v25 = vpop.f32.mrb[3].mxu0  ;;  %v2457_v27 = vpop.f32.mrb[3].mxu1 }
 0x212   : > { %vm2471_vm2 = vcmp.gt.f32.partialorder %v4131_v30, 0.0  ;;  %v2487_v36 = vmul.f32 0.5, %v4131_v30  ;;  %v2489_v37 = vmul.f32 0.5, %v4139_v31  ;;  %vm2473_vm3 = vcmp.gt.f32.partialorder %v4139_v31, 0.0 }
 0x213   : > { %v5270_v38 = vsel %vm2470_vm0, %v4130_v24, %v2486_v34  ;;  %v4132_v39 = vadd.f32 %v2243_v32, %v5256_v18  ;;  %v4140_v40 = vadd.f32 %v2455_v33, %v5258_v19  ;;  %v5274_v41 = vsel %vm2472_vm1, %v4138_v26, %v2488_v35  ;;  %v4706_v26 = vld [vmem:[%s5599_s3 + $0x114] ss:$8 sps:$4 sm:$0xff]  }
 0x214   : > { %v4133_v42 = vadd.f32 %v2245_v25, %v5262_v20  ;;  %v4141_v43 = vadd.f32 %v2457_v27, %v5264_v21  ;;  %v2503_v44 = vsel %vm2471_vm2, %v4131_v30, %v2487_v36  ;;  %v5279_v51 = vsel %vm2473_vm3, %v4139_v31, %v2489_v37  ;;  %v4704_v27 = vld [vmem:[%s5599_s3 + $0x110] ss:$8 sps:$4 sm:$0xff]   ;;  %v4709_v36 = vld [vmem:[%s5599_s3 + $0x124] ss:$8 sps:$4 sm:$0xff]   ;;  %v4707_v37 = vld [vmem:[%s5599_s3 + $0x120] ss:$8 sps:$4 sm:$0xff]  }
 0x215   : > { %vm2474_vm4 = vcmp.gt.f32.partialorder %v4132_v39, 0.0  ;;  %v2490_v45 = vmul.f32 0.5, %v4132_v39  ;;  %vm2476_vm5 = vcmp.gt.f32.partialorder %v4140_v40, 0.0  ;;  %v2492_v46 = vmul.f32 0.5, %v4140_v40 }
 0x216   : > { %vm2475_vm6 = vcmp.gt.f32.partialorder %v4133_v42, 0.0  ;;  %v2491_v47 = vmul.f32 0.5, %v4133_v42  ;;  %v2493_v48 = vmul.f32 0.5, %v4141_v43  ;;  %v2249_v49 = vpop.f32.mrb[4].mxu0  ;;  %v2461_v50 = vpop.f32.mrb[4].mxu1  ;;  %vm2477_vm7 = vcmp.gt.f32.partialorder %v4141_v43, 0.0 }
 0x217   : > { %v2506_v52 = vsel %vm2474_vm4, %v4132_v39, %v2490_v45  ;;  %v5281_v53 = vsel %vm2476_vm5, %v4140_v40, %v2492_v46  ;;  %v4134_v54 = vadd.f32 %v2249_v49, %v5256_v18  ;;  %v4142_v55 = vadd.f32 %v2461_v50, %v5258_v19  ;;  %v2251_v56 = vpop.f32.mrb[5].mxu0  ;;  %v2463_v57 = vpop.f32.mrb[5].mxu1  ;;  %v4710_v39 = vld [vmem:[%s5599_s3 + $0x130] ss:$8 sps:$4 sm:$0xff]   ;;  %v4715_v40 = vld [vmem:[%s5599_s3 + $0x144] ss:$8 sps:$4 sm:$0xff]  }
 0x218   : > { %v2518_v58 = vpack.c.bf16 %v2506_v52, %v5270_v38  ;;  %v2520_v59 = vpack.c.bf16 %v5281_v53, %v5274_v41  ;;  %v4135_v60 = vadd.f32 %v2251_v56, %v5262_v20  ;;  %v4143_v61 = vadd.f32 %v2463_v57, %v5264_v21  ;;  %v2253_v62 = vpop.f32.mrb[6].mxu0  ;;  %v2465_v63 = vpop.f32.mrb[6].mxu1  ;;  %v4712_v38 = vld [vmem:[%s5599_s3 + $0x134] ss:$8 sps:$4 sm:$0xff]   ;;  %v4721_v45 = vld [vmem:[%s5599_s3 + $0x164] ss:$8 sps:$4 sm:$0xff]  }
 0x219   : > { %vm2478_vm8 = vcmp.gt.f32.partialorder %v4134_v54, 0.0  ;;  %v2494_v0 = vmul.f32 0.5, %v4134_v54  ;;  %vm2480_vm9 = vcmp.gt.f32.partialorder %v4142_v55, 0.0  ;;  %v2255_v1 = vpop.f32.mrb[7].mxu0  ;;  %v2467_v2 = vpop.f32.mrb[7].mxu1  ;;  %v2496_v3 = vmul.f32 0.5, %v4142_v55 }
 0x21a   : > { %vm2479_vm10 = vcmp.gt.f32.partialorder %v4135_v60, 0.0  ;;  %v2495_v4 = vmul.f32 0.5, %v4135_v60  ;;  %vm2481_vm11 = vcmp.gt.f32.partialorder %v4143_v61, 0.0  ;;  %v4136_v5 = vadd.f32 %v2253_v62, %v5256_v18  ;;  %v4719_v46 = vld [vmem:[%s5599_s3 + $0x160] ss:$8 sps:$4 sm:$0xff]   ;;  %v4761_v41 = vld [vmem:[%s5601_s5 + $0x70] sm:$0xff]  }
 0x21b   : > { %v4144_v6 = vadd.f32 %v2465_v63, %v5258_v19  ;;  %v4137_v7 = vadd.f32 %v2255_v1, %v5262_v20  ;;  %v4145_v8 = vadd.f32 %v2467_v2, %v5264_v21  ;;  %v2497_v9 = vmul.f32 0.5, %v4143_v61  ;;  %v4701_v19 = vld [vmem:[%s5599_s3 + $0x100] ss:$8 sps:$4 sm:$0xff]   ;;  %v4727_v49 = vld [vmem:[%s5599_s3 + $0x184] ss:$8 sps:$4 sm:$0xff]   ;;  %v4762_v53 = vld [vmem:[%s5601_s5 + $0x30] sm:$0xff]  }
 0x21c   : > { %v2507_v10 = vsel %vm2475_vm6, %v4133_v42, %v2491_v47  ;;  %v2511_v11 = vsel %vm2479_vm10, %v4135_v60, %v2495_v4  ;;  %v2509_v14 = vsel %vm2477_vm7, %v4141_v43, %v2493_v48  ;;  %vm2482_vm12 = vcmp.gt.f32.partialorder %v4136_v5, 0.0  ;;  %v4713_v42 = vld [vmem:[%s5599_s3 + $0x140] ss:$8 sps:$4 sm:$0xff]   ;;  %v4718_v43 = vld [vmem:[%s5599_s3 + $0x154] ss:$8 sps:$4 sm:$0xff]  }
 0x21d   : > { %v2498_v15 = vmul.f32 0.5, %v4136_v5  ;;  %vm2484_vm13 = vcmp.gt.f32.partialorder %v4144_v6, 0.0  ;;  %v2500_v17 = vmul.f32 0.5, %v4144_v6  ;;  %vm2483_vm14 = vcmp.gt.f32.partialorder %v4137_v7, 0.0  ;;  %v4724_v47 = vld [vmem:[%s5599_s3 + $0x174] ss:$8 sps:$4 sm:$0xff]  }
 0x21e   : > { %v2499_v22 = vmul.f32 0.5, %v4137_v7  ;;  %vm2485_vm15 = vcmp.gt.f32.partialorder %v4145_v8, 0.0  ;;  %v2501_v18 = vmul.f32 0.5, %v4145_v8  ;;  %v2519_v23 = vpack.c.bf16 %v2507_v10, %v2503_v44  ;;  %v4716_v44 = vld [vmem:[%s5599_s3 + $0x150] ss:$8 sps:$4 sm:$0xff]   ;;  %v4760_v4 = vld [vmem:[%s5601_s5 + $0x28] sm:$0xff]  }
 0x21f   : > { %v2510_v20 = vsel %vm2478_vm8, %v4134_v54, %v2494_v0  ;;  %v2514_v21 = vsel %vm2482_vm12, %v4136_v5, %v2498_v15  ;;  %v2521_v24 = vpack.c.bf16 %v2509_v14, %v5279_v51  ;;  %v5305_v30 = vsel %vm2481_vm11, %v4143_v61, %v2497_v9  ;;  %v4722_v48 = vld [vmem:[%s5599_s3 + $0x170] ss:$8 sps:$4 sm:$0xff]   ;;  %v4725_v50 = vld [vmem:[%s5599_s3 + $0x180] ss:$8 sps:$4 sm:$0xff]   ;;  %v4730_v51 = vld [vmem:[%s5599_s3 + $0x194] ss:$8 sps:$4 sm:$0xff]  }
 0x220   : > { %v2515_v28 = vsel %vm2483_vm14, %v4137_v7, %v2499_v22  ;;  %v2522_v29 = vpack.c.bf16 %v2514_v21, %v2510_v20  ;;  %v5307_v31 = vsel %vm2485_vm15, %v4145_v8, %v2501_v18  ;;  %2954 = vmatprep.mubr.bf16.mxu0 %v2519_v23  ;;  %v5312_v34 = vsel %vm2480_vm9, %v4142_v55, %v2496_v3  ;;  %v4728_v52 = vld [vmem:[%s5599_s3 + $0x190] ss:$8 sps:$4 sm:$0xff]   ;;  %v4733_v54 = vld [vmem:[%s5599_s3 + $0x1a4] ss:$8 sps:$4 sm:$0xff]   ;;  %v4731_v55 = vld [vmem:[%s5599_s3 + $0x1a0] ss:$8 sps:$4 sm:$0xff]  }
 0x221   : > { %v2523_v32 = vpack.c.bf16 %v2515_v28, %v2511_v11  ;;  %v2525_v33 = vpack.c.bf16 %v5307_v31, %v5305_v30  ;;  %v5315_v35 = vsel %vm2484_vm13, %v4144_v6, %v2500_v17  ;;  %2955 = vmatmul.mubr.bf16.vlgmr.msra.gmra.mrb[8].mxu0 %v2518_v58  ;;  %v4736_v56 = vld [vmem:[%s5599_s3 + $0x1b4] ss:$8 sps:$4 sm:$0xff]   ;;  %v4734_v57 = vld [vmem:[%s5599_s3 + $0x1b0] ss:$8 sps:$4 sm:$0xff]   ;;  %v4739_v58 = vld [vmem:[%s5599_s3 + $0x1c4] ss:$8 sps:$4 sm:$0xff]  }
 0x222   : > { %v2524_v25 = vpack.c.bf16 %v5315_v35, %v5312_v34  ;;  %2976 = vmatpush1.bf16.msra.mxu0 %v4701_v19  ;;  %v4737_v60 = vld [vmem:[%s5599_s3 + $0x1c0] ss:$8 sps:$4 sm:$0xff]   ;;  %v4742_v61 = vld [vmem:[%s5599_s3 + $0x1d4] ss:$8 sps:$4 sm:$0xff]   ;;  %v4740_v62 = vld [vmem:[%s5599_s3 + $0x1d0] ss:$8 sps:$4 sm:$0xff]  }
 0x223   : > { %2964 = vmatprep.mubr.bf16.mxu0 %v2523_v32  ;;  %2977 = vmatprep.subr.bf16.mxu0 %v4706_v26  ;;  %v4745_v63 = vld [vmem:[%s5599_s3 + $0x1e4] ss:$8 sps:$4 sm:$0xff]   ;;  %v4743_v0 = vld [vmem:[%s5599_s3 + $0x1e0] ss:$8 sps:$4 sm:$0xff]   ;;  %v4748_v1 = vld [vmem:[%s5599_s3 + $0x1f4] ss:$8 sps:$4 sm:$0xff]  }
 0x224   : > { %v4746_v2 = vld [vmem:[%s5599_s3 + $0x1f0] ss:$8 sps:$4 sm:$0xff]   ;;  %v4759_v3 = vld [vmem:[%s5601_s5 + $0x68] sm:$0xff]   ;;  %v4765_v6 = vld [vmem:[%s5603_s7] sm:$0xff]  }
 0x225   : > { %4052 = vmatprep.subr.bf16.mxu1 %v4759_v3  ;;  %v4764_v5 = vld [vmem:[%s5601_s5 + $0x38] sm:$0xff]   ;;  %v2590_v7 = vld [vmem:[%s5600_s4] sm:$0x3]  ;;  %v4766_v35 = vld [vmem:[%s5603_s7 + $0x8] sm:$0xff]  }
 0x226   : > { %2978 = vmatpush1.bf16.msra.mxu0 %v4704_v27  ;;  %4053 = vmatpush3.bf16.msra.mxu1 %v4760_v4  ;;  %v2595_v8 = vrot.slane %v2590_v7, %v668_v13  ;;  %v2599_v9 = vrot.slane %v2590_v7, %v672_v16 }
 0x227   : > { %2979 = vmatprep.subr.bf16.mxu0 %v4709_v36  ;;  %4054 = vmatprep.subr.bf16.mxu1 %v4761_v41 }
 0x229   : > { %2965 = vmatmul.mubr.bf16.gmra.mrb[12].mxu0 %v2522_v29 }
 0x22a   : > { %2980 = vmatpush1.bf16.msra.mxu0 %v4707_v37  ;;  %3007 = vmatprep.mubr.bf16.mxu0 %v2521_v24 }
 0x22b   : > { %2981 = vmatprep.subr.bf16.mxu0 %v4712_v38  ;;  %4055 = vmatpush3.bf16.msra.mxu1 %v4762_v53 }
 0x22e   : > { %2982 = vmatpush1.bf16.msra.mxu0 %v4710_v39 }
 0x22f   : > { %2983 = vmatprep.subr.bf16.mxu0 %v4715_v40 }
 0x232   : > { %2984 = vmatpush1.bf16.msra.mxu0 %v4713_v42  ;;  %v4767_v42 = vld [vmem:[%s5603_s7 + $0x10] sm:$0xff]  }
 0x233   : > { %2985 = vmatprep.subr.bf16.mxu0 %v4718_v43 }
 0x236   : > { %2986 = vmatpush1.bf16.msra.mxu0 %v4716_v44 }
 0x237   : > { %2987 = vmatprep.subr.bf16.mxu0 %v4721_v45 }
 0x23a   : > { %2988 = vmatpush1.bf16.msra.mxu0 %v4719_v46 }
 0x23b   : > { %2989 = vmatprep.subr.bf16.mxu0 %v4724_v47 }
 0x23e   : > { %2990 = vmatpush1.bf16.msra.mxu0 %v4722_v48 }
 0x23f   : > { %2991 = vmatprep.subr.bf16.mxu0 %v4727_v49  ;;  %v4768_v49 = vld [vmem:[%s5603_s7 + $0x18] sm:$0xff]  }
 0x242   : > { %2992 = vmatpush1.bf16.msra.mxu0 %v4725_v50  ;;  %v4769_v50 = vld [vmem:[%s5603_s7 + $0x20] sm:$0xff]  }
 0x243   : > { %2993 = vmatprep.subr.bf16.mxu0 %v4730_v51  ;;  %v4770_v51 = vld [vmem:[%s5603_s7 + $0x28] sm:$0xff]  }
 0x246   : > { %2994 = vmatpush1.bf16.msra.mxu0 %v4728_v52  ;;  %v4771_v52 = vld [vmem:[%s5603_s7 + $0x30] sm:$0xff]  }
 0x247   : > { %2995 = vmatprep.subr.bf16.mxu0 %v4733_v54  ;;  %v4772_v54 = vld [vmem:[%s5603_s7 + $0x38] sm:$0xff]  }
 0x24a   : > { %2996 = vmatpush1.bf16.msra.mxu0 %v4731_v55  ;;  %v4773_v55 = vld [vmem:[%s5604_s8] sm:$0xff]  }
 0x24b   : > { %2997 = vmatprep.subr.bf16.mxu0 %v4736_v56 }
 0x24e   : > { %2998 = vmatpush1.bf16.msra.mxu0 %v4734_v57  ;;  %v3994_v57 = vld [vmem:[%s5602_s6] ss:$0 sm:$0xff] }
 0x24f   : > { %2999 = vmatprep.subr.bf16.mxu0 %v4739_v58 }
 0x252   : > { %3000 = vmatpush1.bf16.msra.mxu0 %v4737_v60 }
 0x253   : > { %3001 = vmatprep.subr.bf16.mxu0 %v4742_v61 }
 0x256   : > { %3002 = vmatpush1.bf16.msra.mxu0 %v4740_v62 }
 0x257   : > { %3003 = vmatprep.subr.bf16.mxu0 %v4745_v63 }
 0x25a   : > { %3004 = vmatpush1.bf16.msra.mxu0 %v4743_v0 }
 0x25b   : > { %3005 = vmatprep.subr.bf16.mxu0 %v4748_v1 }
 0x25e   : > { %3006 = vmatpush1.bf16.msra.mxu0 %v4746_v2 }
 0x261   : > { %3008 = vmatmul.mubr.bf16.vlgmr.msra.gmra.mrb[8].mxu0 %v2520_v59  ;;  %v4763_v59 = vld [vmem:[%s5601_s5 + $0x78] sm:$0xff]  }
 0x262   : > { %3017 = vmatprep.mubr.bf16.mxu0 %v2525_v33  ;;  %4056 = vmatprep.subr.bf16.mxu1 %v4763_v59 }
 0x263   : > { %4057 = vmatpush3.bf16.msra.mxu1 %v4764_v5 }
 0x264   : > { %4090 = vmatprep.subr.bf16.mxu1 %v4765_v6 }
 0x269   : > { %3018 = vmatmul.mubr.bf16.gmra.mrb[12].mxu0 %v2524_v25 }
 0x334   : > { %v3009_v10 = vpop.f32.mrb[8].mxu0 }
 0x335   : > { %v4146_v11 = vadd.f32 %v3009_v10, %v2595_v8  ;;  %v3011_v14 = vpop.f32.mrb[9].mxu0 }
 0x336   : > { %v4147_v15 = vadd.f32 %v3011_v14, %v2599_v9  ;;  %v3013_v17 = vpop.f32.mrb[10].mxu0 }
 0x337   : > { %v3036_v22 = vmul.f32 0.5, %v4146_v11  ;;  %v4148_v18 = vadd.f32 %v3013_v17, %v2595_v8  ;;  %v3015_v23 = vpop.f32.mrb[11].mxu0  ;;  %vm3028_vm0 = vcmp.gt.f32.partialorder %v4146_v11, 0.0 }
 0x338   : > { %v3037_v19 = vmul.f32 0.5, %v4147_v15  ;;  %v4149_v20 = vadd.f32 %v3015_v23, %v2599_v9  ;;  %vm3029_vm1 = vcmp.gt.f32.partialorder %v4147_v15, 0.0  ;;  %v4775_v23 = vld [vmem:[%s5604_s8 + $0x10] sm:$0xff]  }
 0x339   : > { %vm3030_vm2 = vcmp.gt.f32.partialorder %v4148_v18, 0.0  ;;  %v3038_v21 = vmul.f32 0.5, %v4148_v18  ;;  %v3044_v13 = vsel %vm3028_vm0, %v4146_v11, %v3036_v22 }
 0x33a   : > { %vm3031_vm3 = vcmp.gt.f32.partialorder %v4149_v20, 0.0  ;;  %v3039_v24 = vmul.f32 0.5, %v4149_v20  ;;  %v3045_v28 = vsel %vm3029_vm1, %v4147_v15, %v3037_v19  ;;  %v4774_v15 = vld [vmem:[%s5604_s8 + $0x8] sm:$0xff]  }
 0x33b   : > { %v3046_v26 = vsel %vm3030_vm2, %v4148_v18, %v3038_v21 }
 0x33c   : > { %v3052_v12 = vpack.c.bf16 %v3046_v26, %v3044_v13  ;;  %v3019_v16 = vpop.f32.mrb[12].mxu0  ;;  %v3047_v29 = vsel %vm3031_vm3, %v4149_v20, %v3039_v24  ;;  %v4776_v20 = vld [vmem:[%s5604_s8 + $0x18] sm:$0xff]   ;;  %v4777_v26 = vld [vmem:[%s5604_s8 + $0x20] sm:$0xff]  }
 0x33d   : > { %v4150_v30 = vadd.f32 %v3019_v16, %v2595_v8  ;;  %v3021_v31 = vpop.f32.mrb[13].mxu0  ;;  %v3053_v32 = vpack.c.bf16 %v3047_v29, %v3045_v28  ;;  %v4778_v28 = vld [vmem:[%s5604_s8 + $0x28] sm:$0xff]  }
 0x33e   : > { %v4151_v33 = vadd.f32 %v3021_v31, %v2599_v9  ;;  %v3023_v34 = vpop.f32.mrb[14].mxu0 }
 0x33f   : > { %v3040_v25 = vmul.f32 0.5, %v4150_v30  ;;  %v4152_v27 = vadd.f32 %v3023_v34, %v2595_v8  ;;  %v3025_v36 = vpop.f32.mrb[15].mxu0  ;;  %3223 = vmatprep.mubr.bf16.mxu1 %v3053_v32  ;;  %vm3032_vm4 = vcmp.gt.f32.partialorder %v4150_v30, 0.0  ;;  %v4779_v32 = vld [vmem:[%s5604_s8 + $0x30] sm:$0xff]  }
 0x340   : > { %v3041_v37 = vmul.f32 0.5, %v4151_v33  ;;  %v4153_v38 = vadd.f32 %v3025_v36, %v2599_v9  ;;  %3224 = vmatmul.mubr.bf16.vlgmr.msra.gmra.mrb[8].mxu1 %v3052_v12  ;;  %vm3033_vm5 = vcmp.gt.f32.partialorder %v4151_v33, 0.0 }
 0x341   : > { %vm3034_vm6 = vcmp.gt.f32.partialorder %v4152_v27, 0.0  ;;  %v3042_v39 = vmul.f32 0.5, %v4152_v27  ;;  %4091 = vmatpush3.bf16.msra.mxu1 %v4765_v6  ;;  %v3048_v43 = vsel %vm3032_vm4, %v4150_v30, %v3040_v25 }
 0x342   : > { %vm3035_vm7 = vcmp.gt.f32.partialorder %v4153_v38, 0.0  ;;  %v3043_v40 = vmul.f32 0.5, %v4153_v38  ;;  %4092 = vmatprep.subr.bf16.mxu1 %v4766_v35  ;;  %v3049_v45 = vsel %vm3033_vm5, %v4151_v33, %v3041_v37  ;;  %v4780_v33 = vld [vmem:[%s5604_s8 + $0x38] sm:$0xff]  }
 0x343   : > { %v3050_v44 = vsel %vm3034_vm6, %v4152_v27, %v3042_v39 }
 0x344   : > { %v3051_v46 = vsel %vm3035_vm7, %v4153_v38, %v3043_v40  ;;  %v3054_v47 = vpack.c.bf16 %v3050_v44, %v3048_v43 }
 0x345   : > { %v3055_v48 = vpack.c.bf16 %v3051_v46, %v3049_v45  ;;  %4093 = vmatpush3.bf16.msra.mxu1 %v4766_v35 }
 0x346   : > { %4094 = vmatprep.subr.bf16.mxu1 %v4767_v42 }
 0x347   : > { %3231 = vmatprep.mubr.bf16.mxu1 %v3055_v48 }
 0x348   : > { %3232 = vmatmul.mubr.bf16.gmra.mrb[12].mxu1 %v3054_v47 }
 0x349   : > { %4095 = vmatpush3.bf16.msra.mxu1 %v4767_v42 }
 0x34a   : > { %4096 = vmatprep.subr.bf16.mxu1 %v4768_v49 }
 0x34d   : > { %4097 = vmatpush3.bf16.msra.mxu1 %v4768_v49 }
 0x34e   : > { %4098 = vmatprep.subr.bf16.mxu1 %v4769_v50 }
 0x351   : > { %4099 = vmatpush3.bf16.msra.mxu1 %v4769_v50 }
 0x352   : > { %4100 = vmatprep.subr.bf16.mxu1 %v4770_v51 }
 0x355   : > { %4101 = vmatpush3.bf16.msra.mxu1 %v4770_v51 }
 0x356   : > { %4102 = vmatprep.subr.bf16.mxu1 %v4771_v52 }
 0x359   : > { %4103 = vmatpush3.bf16.msra.mxu1 %v4771_v52 }
 0x35a   : > { %4104 = vmatprep.subr.bf16.mxu1 %v4772_v54 }
 0x35d   : > { %4105 = vmatpush3.bf16.msra.mxu1 %v4772_v54 }
 0x35e   : > { %4110 = vmatprep.subr.bf16.mxu1 %v4773_v55 }
 0x413   : > { %v4058_v56 = vpop.f32.mrb[8].mxu1 }
 0x414   : > { %v4059_v58 = vpop.f32.mrb[9].mxu1 }
 0x415   : > { %v4060_v60 = vadd.f32 %v4059_v58, %v4058_v56  ;;  %v4061_v61 = vpop.f32.mrb[10].mxu1 }
 0x416   : > { %v4062_v62 = vpop.f32.mrb[11].mxu1 }
 0x417   : > { %v3226_v63 = vadd.f32 %v4060_v60, %v3994_v57  ;;  %v4063_v0 = vadd.f32 %v4062_v62, %v4061_v61 }
 0x419   : > { %v4011_v1 = vmul.f32 -1.442695, %v3226_v63  ;;  %v3229_v2 = vadd.f32 %v4063_v0, %v3994_v57 }
 0x41b   : > { %4781 = vpow2.f32 %v4011_v1  ;;  %v4012_v3 = vmul.f32 -1.442695, %v3229_v2  ;;  %v4064_v4 = vpop.f32.mrb[12].mxu1  ;;  %v3268_v41 = vpack.c.bf16 %v3229_v2, %v3226_v63 }
 0x41c   : > { %v4065_v53 = vpop.f32.mrb[13].mxu1 }
 0x41d   : > { %4783 = vpow2.f32 %v4012_v3  ;;  %v4066_v59 = vadd.f32 %v4065_v53, %v4064_v4  ;;  %v4067_v5 = vpop.f32.mrb[14].mxu1  ;;  %4106 = vmatprep.mubr.bf16.mxu1 %v3268_v41 }
 0x41e   : > { %v4068_v6 = vpop.f32.mrb[15].mxu1 }
 0x41f   : > { %v3234_v7 = vadd.f32 %v4066_v59, %v3994_v57  ;;  %v4069_v8 = vadd.f32 %v4068_v6, %v4067_v5 }
 0x421   : > { %v4013_v9 = vmul.f32 -1.442695, %v3234_v7  ;;  %v3237_v10 = vadd.f32 %v4069_v8, %v3994_v57 }
 0x423   : > { %4785 = vpow2.f32 %v4013_v9  ;;  %v4014_v11 = vmul.f32 -1.442695, %v3237_v10  ;;  %v3269_v14 = vpack.c.bf16 %v3237_v10, %v3234_v7 }
 0x425   : > { %v4782_v17 = vpop.eup %4781  ;;  %4787 = vpow2.f32 %v4014_v11  ;;  %4107 = vmatmul.mubr.bf16.vlgmr.msra.gmra.mrb[16].mxu1 %v3269_v14 }
 0x426   : > { %v3252_v22 = vadd.f32 1.0, %v4782_v17  ;;  %4111 = vmatpush3.bf16.msra.mxu1 %v4773_v55 }
 0x427   : > { %v4784_v18 = vpop.eup %4783  ;;  %4112 = vmatprep.subr.bf16.mxu1 %v4774_v15 }
 0x428   : > { %4789 = vrcp.f32 %v3252_v22  ;;  %v3253_v19 = vadd.f32 1.0, %v4784_v18 }
 0x42a   : > { %4791 = vrcp.f32 %v3253_v19  ;;  %4113 = vmatpush3.bf16.msra.mxu1 %v4774_v15 }
 0x42b   : > { %4114 = vmatprep.subr.bf16.mxu1 %v4775_v23 }
 0x42d   : > { %v4786_v21 = vpop.eup %4785 }
 0x42e   : > { %v3254_v24 = vadd.f32 1.0, %v4786_v21  ;;  %4115 = vmatpush3.bf16.msra.mxu1 %v4775_v23 }
 0x42f   : > { %v4788_v13 = vpop.eup %4787  ;;  %4116 = vmatprep.subr.bf16.mxu1 %v4776_v20 }
 0x430   : > { %4793 = vrcp.f32 %v3254_v24  ;;  %v3255_v12 = vadd.f32 1.0, %v4788_v13 }
 0x432   : > { %v4790_v16 = vpop.eup %4789  ;;  %4795 = vrcp.f32 %v3255_v12  ;;  %4117 = vmatpush3.bf16.msra.mxu1 %v4776_v20 }
 0x433   : > { %4118 = vmatprep.subr.bf16.mxu1 %v4777_v26  ;;  %3264 = vst [vmem:[%s5491_s11] sm:$0xff] %v4790_v16 }
 0x434   : > { %v4792_v29 = vpop.eup %4791 }
 0x435   : > { %3265 = vst [vmem:[%s5491_s11 + $0x8] sm:$0xff] %v4792_v29 }
 0x436   : > { %4119 = vmatpush3.bf16.msra.mxu1 %v4777_v26 }
 0x437   : > { %4120 = vmatprep.subr.bf16.mxu1 %v4778_v28 }
 0x43a   : > { %v4794_v30 = vpop.eup %4793  ;;  %4121 = vmatpush3.bf16.msra.mxu1 %v4778_v28 }
 0x43b   : > { %3266 = vst [vmem:[%s5491_s11 + $0x10] sm:$0xff] %v4794_v30  ;;  %4122 = vmatprep.subr.bf16.mxu1 %v4779_v32 }
 0x43c   : > { %v4796_v31 = vpop.eup %4795 }
 0x43d   : > { %3267 = vst [vmem:[%s5491_s11 + $0x18] sm:$0xff] %v4796_v31  ;;  %s4829_s11 = sshll.u32 %s4928_s30, 4  ;;  %s4830_s11 = int_to_ptr.vmem [resolvable:$false] %s4829_s11 }
 0x43e   : > { %4123 = vmatpush3.bf16.msra.mxu1 %v4779_v32  ;;  %s4831_s12 = scalar_lea.vmem %s4830_s11, 1024  ;;  %p4832_p2 = scmp.lt.s32.totalorder %s5504_s18, %s4830_s11 }
 0x43f   : > { %4124 = vmatprep.subr.bf16.mxu1 %v4780_v33  ;;  %p4833_p3 = scmp.lt.s32.totalorder %s4831_s12, %s4825_s29 }
 0x441   : > { %p4834_p4 = por %p4833_p3, %p4832_p2 }
 0x442   : > { %4125 = vmatpush3.bf16.msra.mxu1 %v4780_v33 }
 0x443   : > { %p4835_p7 = pnand %p4834_p4, %p4828_p12 }
 0x4f8   : > { %v4108_v34 = vpop.f32.mrb[16].mxu1 }
 0x4f9   : > { %v3368_v35 = vpop.f32.mrb[17].mxu1  ;;  %v3385_v27 = vmax.f32 %v4108_v34, 0.0 }
 0x4fa   : > { %v4109_v25 = vpop.f32.mrb[18].mxu1  ;;  %v3383_v38 = vmax.f32 %v3368_v35, 0.0 }
 0x4fb   : > { %v3386_v36 = vmax.f32 %v4109_v25, 0.0  ;;  %v3371_v37 = vpop.f32.mrb[19].mxu1 }
 0x4fc   : > { %v3384_v39 = vmax.f32 %v3371_v37, 0.0 }
 0x4fd   : > { %v3388_v40 = vpack.c.bf16 %v3386_v36, %v3385_v27 }
 0x4fe   : > { %v3387_v42 = vpack.c.bf16 %v3384_v39, %v3383_v38 }
 0x500   : > { %4126 = vmatprep.mubr.bf16.mxu1 %v3387_v42 }
 0x501   : > { %4127 = vmatmul.mubr.bf16.vlgmr.msra.gmra.mrb[20].mxu1 %v3388_v40 }
 0x502   : > { %4838 = shalt.err (!%p4835_p7)
}
 0x503   : > { %s4839_s27 = scalar_lea.hbm %s5512_s20, 512  ;;  %s4843_s30 = scalar_lea.hbm %s5605_s9, 1024 }
 0x504   : > { %p4840_p8 = scmp.ne.s32.totalorder %s5512_s20, %s4839_s27  ;;  %p4844_p1 = scmp.lt.u32.totalorder %s5512_s20, %s5605_s9 }
 0x505   : > { %p4845_p0 = scmp.lt.u32.totalorder %s4843_s30, %s4839_s27  ;;  %p4847_p6 = scmp.lt.u32.totalorder %s4839_s27, %s5512_s20 }
 0x506   : > { %p4841_p11 = pnand %p4840_p8, %p5624_p9 }
 0x507   : > { %p4846_p5 = por %p4845_p0, %p4844_p1 }
 0x508   : > { %p4842_p13 = pneg %p4841_p11 }
 0x509   : > { %p4848_p10 = por %p4847_p6, %p4846_p5 }
 0x50b   : > { %p4849_p12 = pnand %p4848_p10, %p4842_p13 }
 0x50d   : > { %4852 = shalt.err (!%p4849_p12)
}
 0x50e   : > { %s5612_s12 = smov 128   ;;  %s4930_s25 = smov 8  }
 0x50f   : > { %s5625_s21 = scalar_lea.sflag [#allocation4], %s5477_s26  ;;  %s5626_s29 = sshll.u32 %s5477_s26, 5 }
 0x510   : > { %4214 = dma.vmem_to_hbm [thread:$0]  (%p5624_p9), %s5504_s18, 512, %s5512_s20, %s5625_s21, %s5612_s12, %s5612_s12, %s4930_s25  }
 0x511   : > { %s381_s27 = scalar_lea.vmem [#allocation6], %s5626_s29  ;;  %s5627_s30 = sshll.u32 %s5008_s17, 9 }
 0x512   : > { %s3541_s28 = sshll.u32 %s381_s27, 4  ;;  %s5550_s1 = scalar_lea.hbm %s5606_s10, %s5627_s30  ;;  %s5543_s28 = int_to_ptr.vmem [resolvable:$true] %s3541_s28 }
 0x513   : > { %s3512_s18 = scalar_lea.sflag [#allocation7], %s5477_s26  ;;  %s4853_s20 = scalar_lea.vmem %s5543_s28, 512 }
 0x514   : > { %p4854_p2 = scmp.ne.s32.totalorder %s5543_s28, %s4853_s20  ;;  %s4931_s21 = smov [#allocation6]  }
 0x515   : > { %s4857_s29 = sshll.u32 %s4931_s21, 4  ;;  %s4858_s29 = int_to_ptr.vmem [resolvable:$false] %s4857_s29 }
 0x516   : > { %p4855_p3 = pnand %p4854_p2, %p5624_p9  ;;  %s4859_s12 = scalar_lea.vmem %s4858_s29, 1024 }
 0x517   : > { %p4860_p7 = scmp.lt.s32.totalorder %s5543_s28, %s4858_s29  ;;  %p4861_p8 = scmp.lt.s32.totalorder %s4859_s12, %s4853_s20 }
 0x518   : > { %p4856_p4 = pneg %p4855_p3 }
 0x519   : > { %p4862_p11 = por %p4861_p8, %p4860_p7 }
 0x51b   : > { %p4863_p13 = pnand %p4862_p11, %p4856_p4 }
 0x5d4   : > { %v4128_v43 = vpop.f32.mrb[20].mxu1 }
 0x5d5   : > { %3504 = vst [vmem:[%s381_s27 + $0x10] sm:$0xff] %v4128_v43  ;;  %v3487_v44 = vpop.f32.mrb[21].mxu1 }
 0x5d6   : > { %3502 = vst [vmem:[%s381_s27] sm:$0xff] %v3487_v44  ;;  %v4129_v45 = vpop.f32.mrb[22].mxu1 }
 0x5d7   : > { %3505 = vst [vmem:[%s381_s27 + $0x18] sm:$0xff] %v4129_v45  ;;  %v3490_v46 = vpop.f32.mrb[23].mxu1 }
 0x5d8   : > { %3503 = vst [vmem:[%s381_s27 + $0x8] sm:$0xff] %v3490_v46 }
 0x5d9   : > { %4866 = shalt.err (!%p4863_p13)
}
 0x5da   : > { %s4867_s0 = scalar_lea.hbm %s5550_s1, 512  ;;  %s4871_s30 = scalar_lea.hbm %s5606_s10, 1024 }
 0x5db   : > { %p4868_p1 = scmp.ne.s32.totalorder %s5550_s1, %s4867_s0  ;;  %p4872_p6 = scmp.lt.u32.totalorder %s5550_s1, %s5606_s10 }
 0x5dc   : > { %p4873_p10 = scmp.lt.u32.totalorder %s4871_s30, %s4867_s0  ;;  %p4875_p2 = scmp.lt.u32.totalorder %s4867_s0, %s5550_s1 }
 0x5dd   : > { %p4869_p0 = pnand %p4868_p1, %p5624_p9 }
 0x5de   : > { %p4874_p12 = por %p4873_p10, %p4872_p6 }
 0x5df   : > { %p4870_p5 = pneg %p4869_p0 }
 0x5e0   : > { %p4876_p3 = por %p4875_p2, %p4874_p12 }
 0x5e2   : > { %p4877_p4 = pnand %p4876_p3, %p4870_p5 }
 0x5e4   : > { %4880 = shalt.err (!%p4877_p4)
}
 0x5e5   : > { %s5628_s12 = smov 128  }
 0x5e6   : > { %4215 = dma.vmem_to_hbm [thread:$0]  (%p5624_p9), %s5543_s28, 512, %s5550_s1, %s3512_s18, %s5628_s12, %s5628_s12, %s4930_s25  }
 0x5e7 PF: > { %p4231_p7 = scmp.ge.s32.totalorder %s4923_s16, 2  ;;  %s3556_s20 = sand.u32 1, %s4911_s13  }
 0x5e8   : > { %p5629_p8 = scmp.ne.s32.totalorder %s5616_s24, 0  ;;  %s3557_s29 = scalar_lea.sflag [#allocation4], %s3556_s20 }
 0x5ea   : > { %p4223_p11 = pnand %p4231_p7, %p5629_p8 }
 0x5ec   : > { %4902 = dma.done.wait (!%p4223_p11), %s3557_s29, 512  }
 0x5ed   : > { %4904 = vsyncadd (!%p4223_p11), %s3557_s29, 4294966784  ;;  %s3566_s23 = scalar_lea.sflag [#allocation7], %s3556_s20 }
 0x5ee   : > { %4906 = dma.done.wait (!%p4223_p11), %s3566_s23, 512  }
 0x5ef   : > { %4908 = vsyncadd (!%p4223_p11), %s3566_s23, 4294966784  ;;  %p25_p9 = scmp.ge.s32.totalorder %s5012_s19, 4   ;;  %s5630_s13 = smov %s4915_s14 }
 0x5f0   : > { %s5631_s14 = smov %s4919_s15  ;;  %s5632_s15 = smov %s5023_s22 }
 0x5f1   : > { %s5633_s16 = smov %s5012_s19  ;;  %27 = sbr.rel (!%p25_p9) target bundleno = 9 (0x9), region = 113 }
 0x5f8   :  { %3571 = vsyncpa [#allocation3], 1 }
 0x5f9   :  { %3573 = vsyncpa [#allocation3 + $0x1], 1 }
 0x5fa   :  { %3574 = vsyncpa [#allocation4], 1 }
 0x5fb   :  { %3576 = vsyncpa [#allocation4 + $0x1], 1 }
 0x5fc   :  { %3577 = vsyncpa [#allocation7], 1 }
 0x5fd   :  { %3579 = vsyncpa [#allocation7 + $0x1], 1 }

</bundles_post_ra>
